<compile_context>
chip_gen: v7x
topology: tpu7x:2x2x1
jax: 0.10.0
libtpu: 0.0.40
codegen_flags: <defaults>
</compile_context>

<pallas_src>
import functools

import jax
import jax.numpy as jnp
from jax.experimental import pallas as pl
from jax.experimental.pallas import tpu as pltpu

IN_FEATURES = 16384
HIDDEN = 100
HIDDEN_PAD = 128          # lane-dense padded hidden dim (padding is exact zeros)
OUT = 2

SINGLE_TILE_MAX = 256                 # largest padded batch handled as one tile
RESIDENT_BM_CANDIDATES = (128, 64, 32, 16, 8)
DEFAULT_BK = 8192                     # reduction tile for the k-tiled path


def _epilogue(acc, b1_ref, w2_ref, b2_ref, o_ref):
    """Bias + ReLU + second linear + numerically stable softmax; write output."""
    h = jnp.maximum(acc + b1_ref[...], 0.0)
    logits = (
        jnp.dot(h, w2_ref[...], preferred_element_type=jnp.float32) + b2_ref[...]
    )
    m = jnp.max(logits, axis=1, keepdims=True)
    e = jnp.exp(logits - m)
    s = jnp.sum(e, axis=1, keepdims=True)
    o_ref[...] = (e * pl.reciprocal(s, approx=False)).astype(o_ref.dtype)


def netv2_ktiled_kernel(x_ref, w1_ref, b1_ref, w2_ref, b2_ref, o_ref, acc_ref):
    """Single batch tile; grid = (K // bk,).  K (=16384) is the reduction axis."""
    k = pl.program_id(0)

    # (bm, bk) f32 x tile cast to bf16 in-kernel, bf16 W1 tile, f32 MXU accum.
    partial = jnp.dot(
        x_ref[...].astype(jnp.bfloat16), w1_ref[...],
        preferred_element_type=jnp.float32,
    )

    @pl.when(k == 0)
    def _():
        acc_ref[...] = partial          # direct write, no zero-init pass

    @pl.when(k > 0)
    def _():
        acc_ref[...] += partial

    @pl.when(k == pl.num_programs(0) - 1)
    def _():
        _epilogue(acc_ref[...], b1_ref, w2_ref, b2_ref, o_ref)


def netv2_resident_kernel(x_ref, w1_ref, b1_ref, w2_ref, b2_ref, o_ref):
    """Multiple batch tiles; grid = (n_tiles,).  The W1 block index is constant,
    so Pallas DMAs the 4 MiB bf16 W1 exactly once and keeps it VMEM-resident."""
    acc = jnp.dot(
        x_ref[...].astype(jnp.bfloat16), w1_ref[...],
        preferred_element_type=jnp.float32,
    )
    _epilogue(acc, b1_ref, w2_ref, b2_ref, o_ref)


def pack_params(w1, b1, w2, b2):
    """One-time weight packing (call at init, NOT per forward):
    pad hidden 100 -> 128 with exact zeros and cast W1 to bf16."""
    w1p = jnp.pad(w1, ((0, 0), (0, HIDDEN_PAD - HIDDEN))).astype(jnp.bfloat16)
    b1p = (
        jnp.pad(b1, (0, HIDDEN_PAD - HIDDEN)).reshape(1, HIDDEN_PAD).astype(jnp.float32)
    )
    w2p = jnp.pad(w2, ((0, HIDDEN_PAD - HIDDEN), (0, 0))).astype(jnp.float32)
    b2p = b2.reshape(1, OUT).astype(jnp.float32)
    return w1p, b1p, w2p, b2p


def _pick_resident_bm(n_pad):
    for cand in RESIDENT_BM_CANDIDATES:
        if n_pad % cand == 0:
            return cand
    return 8  # unreachable: n_pad is always a multiple of 8


def _vmem_limit_bytes(bm, k_block, resident):
    """Right-sized scoped-VMEM limit from the actual working set (+ headroom),
    instead of hard-coding 64 MiB (v7x physical VMEM per TensorCore)."""
    x_b = bm * k_block * 4 * 2                      # f32 x tile, double-buffered
    w1_b = k_block * HIDDEN_PAD * 2 * 2             # bf16 W1 tile(s), double-buffered
    acc_b = 0 if resident else bm * HIDDEN_PAD * 4  # f32 accumulator scratch
    small = 1 << 20                                 # b1 / W2 / b2 / output blocks
    headroom = 8 << 20                              # compiler-internal scratch
    return x_b + w1_b + acc_b + small + headroom


@functools.partial(jax.jit, static_argnames=("bk",))
def netv2_forward(x, w1p, b1p, w2p, b2p, *, bk=DEFAULT_BK):
    """Forward pass.  Expects pre-packed params from pack_params(); x may be
    f32 or bf16 (the bf16 cast happens inside the kernel)."""
    n, k_in = x.shape
    assert k_in == IN_FEATURES
    assert IN_FEATURES % bk == 0

    # Pad batch to a multiple of 8 (sublane constraint).
    n_pad = ((n + 7) // 8) * 8
    if n_pad != n:
        x = jnp.pad(x, ((0, n_pad - n), (0, 0)))

    if n_pad <= SINGLE_TILE_MAX:
        # Single batch tile: tile K so the W1/x DMA overlaps the MXU work.
        bm = n_pad
        out = pl.pallas_call(
            netv2_ktiled_kernel,
            out_shape=jax.ShapeDtypeStruct((n_pad, OUT), jnp.float32),
            grid_spec=pltpu.PrefetchScalarGridSpec(
                num_scalar_prefetch=0,
                grid=(IN_FEATURES // bk,),
                in_specs=[
                    pl.BlockSpec((bm, bk), lambda k: (0, k)),            # x (f32)
                    pl.BlockSpec((bk, HIDDEN_PAD), lambda k: (k, 0)),    # W1 (bf16)
                    pl.BlockSpec((1, HIDDEN_PAD), lambda k: (0, 0)),     # b1
                    pl.BlockSpec((HIDDEN_PAD, OUT), lambda k: (0, 0)),   # W2
                    pl.BlockSpec((1, OUT), lambda k: (0, 0)),            # b2
                ],
                out_specs=pl.BlockSpec((bm, OUT), lambda k: (0, 0)),
                scratch_shapes=[pltpu.VMEM((bm, HIDDEN_PAD), jnp.float32)],
            ),
            compiler_params=pltpu.CompilerParams(
                dimension_semantics=("arbitrary",),
                vmem_limit_bytes=_vmem_limit_bytes(bm, bk, resident=False),
            ),
        )(x, w1p, b1p, w2p, b2p)
    else:
        # Multiple batch tiles: hold W1 VMEM-resident (fetched once), full-K dot.
        # TODO(synk): optional v7x small-batch 2-TensorCore K-split not implemented.
        bm = _pick_resident_bm(n_pad)
        out = pl.pallas_call(
            netv2_resident_kernel,
            out_shape=jax.ShapeDtypeStruct((n_pad, OUT), jnp.float32),
            grid_spec=pltpu.PrefetchScalarGridSpec(
                num_scalar_prefetch=0,
                grid=(n_pad // bm,),
                in_specs=[
                    pl.BlockSpec((bm, IN_FEATURES), lambda i: (i, 0)),          # x (f32)
                    pl.BlockSpec((IN_FEATURES, HIDDEN_PAD), lambda i: (0, 0)),  # W1 resident
                    pl.BlockSpec((1, HIDDEN_PAD), lambda i: (0, 0)),            # b1
                    pl.BlockSpec((HIDDEN_PAD, OUT), lambda i: (0, 0)),          # W2
                    pl.BlockSpec((1, OUT), lambda i: (0, 0)),                   # b2
                ],
                out_specs=pl.BlockSpec((bm, OUT), lambda i: (i, 0)),
            ),
            compiler_params=pltpu.CompilerParams(
                dimension_semantics=("parallel",),
                vmem_limit_bytes=_vmem_limit_bytes(bm, IN_FEATURES, resident=True),
            ),
        )(x, w1p, b1p, w2p, b2p)

    return out[:n]


def init_params(key):
    """Deterministic parameter init (PyTorch-style uniform bounds)."""
    k1, k2, k3, k4 = jax.random.split(key, 4)
    bound1 = 1.0 / (IN_FEATURES ** 0.5)
    bound2 = 1.0 / (HIDDEN ** 0.5)
    # stored as (in, out) == transpose of PyTorch's (out, in) weight
    w1 = jax.random.uniform(k1, (IN_FEATURES, HIDDEN), jnp.float32, -bound1, bound1)
    b1 = jax.random.uniform(k2, (HIDDEN,), jnp.float32, -bound1, bound1)
    w2 = jax.random.uniform(k3, (HIDDEN, OUT), jnp.float32, -bound2, bound2)
    b2 = jax.random.uniform(k4, (OUT,), jnp.float32, -bound2, bound2)
    return w1, b1, w2, b2


def reference_forward_bf16(x, w1, b1, w2, b2):
    """Matches the kernel's numerics: bf16 layer-1 inputs, f32 accumulation."""
    h = jnp.maximum(
        jnp.dot(
            x.astype(jnp.bfloat16),
            w1.astype(jnp.bfloat16),
            preferred_element_type=jnp.float32,
        )
        + b1,
        0.0,
    )
    logits = h @ w2 + b2
    return jax.nn.softmax(logits, axis=1)


def reference_forward_f32(x, w1, b1, w2, b2):
    h = jnp.maximum(x @ w1 + b1, 0.0)
    logits = h @ w2 + b2
    return jax.nn.softmax(logits, axis=1)


if __name__ == "__main__":
    key = jax.random.PRNGKey(0)
    kx, kp = jax.random.split(key)

    w1, b1, w2, b2 = init_params(kp)
    # One-time packing, hoisted out of the forward path.
    packed = tuple(jax.block_until_ready(p) for p in pack_params(w1, b1, w2, b2))

    # --- primary small-batch test (k-tiled single-batch-tile path) ---
    batch = 8
    x = jax.random.normal(kx, (batch, IN_FEATURES), jnp.float32)
    out = jax.block_until_ready(netv2_forward(x, *packed))

    ref_bf16 = reference_forward_bf16(x, w1, b1, w2, b2)
    ref_f32 = reference_forward_f32(x, w1, b1, w2, b2)
    assert out.shape == (batch, OUT)
    assert jnp.allclose(out, ref_bf16, atol=2e-3, rtol=2e-3)
    assert jnp.allclose(out, ref_f32, atol=3e-2, rtol=3e-2)
    assert jnp.allclose(jnp.sum(out, axis=1), 1.0, atol=1e-5)

    # --- secondary test: multi-batch-tile path with VMEM-resident W1 ---
    batch2 = 320
    x2 = jax.random.normal(jax.random.PRNGKey(1), (batch2, IN_FEATURES), jnp.float32)
    out2 = jax.block_until_ready(netv2_forward(x2, *packed))

    ref2 = reference_forward_bf16(x2, w1, b1, w2, b2)
    assert out2.shape == (batch2, OUT)
    assert jnp.allclose(out2, ref2, atol=2e-3, rtol=2e-3)
    assert jnp.allclose(jnp.sum(out2, axis=1), 1.0, atol=1e-5)

    print("KERNEL_OK")
</pallas_src>

<mosaic_0001>
module attributes {stable_mosaic.version = 11 : i64} {
  func.func @netv2_ktiled_kernel(%arg0: i32, %arg1: memref<8x8192xf32, #tpu.memory_space<vmem>>, %arg2: memref<8192x128xbf16, #tpu.memory_space<vmem>>, %arg3: memref<1x128xf32, #tpu.memory_space<vmem>>, %arg4: memref<128x2xf32, #tpu.memory_space<vmem>>, %arg5: memref<1x2xf32, #tpu.memory_space<vmem>>, %arg6: memref<8x2xf32, #tpu.memory_space<vmem>>, %arg7: memref<8x128xf32, #tpu.memory_space<vmem>>) attributes {dimension_semantics = [#tpu.dimension_semantics<arbitrary>], iteration_bounds = array<i64: 2>, scalar_prefetch = 0 : i64, scratch_operands = 1 : i64, tpu.core_type = #tpu.core_type<tc>, window_params = [{transform_indices = @transform_0, window_bounds = array<i64: 8, 8192>}, {transform_indices = @transform_1, window_bounds = array<i64: 8192, 128>}, {pipeline_mode = #tpu.pipeline_mode<synchronous>, transform_indices = @transform_2, window_bounds = array<i64: 1, 128>}, {pipeline_mode = #tpu.pipeline_mode<synchronous>, transform_indices = @transform_3, window_bounds = array<i64: 128, 2>}, {pipeline_mode = #tpu.pipeline_mode<synchronous>, transform_indices = @transform_4, window_bounds = array<i64: 1, 2>}, {pipeline_mode = #tpu.pipeline_mode<synchronous>, transform_indices = @transform_5, window_bounds = array<i64: 8, 2>}]} {
    %c0 = arith.constant 0 : index
    %c0_0 = arith.constant 0 : index
    %0 = vector.load %arg1[%c0, %c0_0] : memref<8x8192xf32, #tpu.memory_space<vmem>>, vector<8x8192xf32>
    %1 = arith.truncf %0 : vector<8x8192xf32> to vector<8x8192xbf16>
    %c0_1 = arith.constant 0 : index
    %c0_2 = arith.constant 0 : index
    %2 = vector.load %arg2[%c0_1, %c0_2] : memref<8192x128xbf16, #tpu.memory_space<vmem>>, vector<8192x128xbf16>
    %cst = arith.constant dense<0.000000e+00> : vector<8x128xf32>
    %3 = tpu.matmul %1, %2, %cst {dimension_numbers = #tpu.dot_dimension_numbers<[1], [0], [0], [1], [0, 0, 1, 1], [], []>} : vector<8x8192xbf16>, vector<8192x128xbf16>, vector<8x128xf32> -> vector<8x128xf32>
    %c0_i32 = arith.constant 0 : i32
    %4 = arith.cmpi eq, %arg0, %c0_i32 : i32
    %5 = arith.extui %4 : i1 to i32
    %c0_i32_3 = arith.constant 0 : i32
    %6 = arith.cmpi ne, %5, %c0_i32_3 : i32
    scf.if %6 {
      %c0_7 = arith.constant 0 : index
      %c0_8 = arith.constant 0 : index
      %13 = vector.load %arg7[%c0_7, %c0_8] : memref<8x128xf32, #tpu.memory_space<vmem>>, vector<8x128xf32>
      tpu.vector_store %arg7[%c0_7, %c0_8], %3 {strides = array<i32>} : memref<8x128xf32, #tpu.memory_space<vmem>>, vector<8x128xf32>,
    } else {
    }
    %c0_i32_4 = arith.constant 0 : i32
    %7 = arith.cmpi sgt, %arg0, %c0_i32_4 : i32
    %8 = arith.extui %7 : i1 to i32
    %c0_i32_5 = arith.constant 0 : i32
    %9 = arith.cmpi ne, %8, %c0_i32_5 : i32
    scf.if %9 {
      %c0_7 = arith.constant 0 : index
      %c0_8 = arith.constant 0 : index
      %13 = vector.load %arg7[%c0_7, %c0_8] : memref<8x128xf32, #tpu.memory_space<vmem>>, vector<8x128xf32>
      %14 = arith.addf %13, %3 : vector<8x128xf32>
      %c0_9 = arith.constant 0 : index
      %c0_10 = arith.constant 0 : index
      %15 = vector.load %arg7[%c0_9, %c0_10] : memref<8x128xf32, #tpu.memory_space<vmem>>, vector<8x128xf32>
      tpu.vector_store %arg7[%c0_9, %c0_10], %14 {strides = array<i32>} : memref<8x128xf32, #tpu.memory_space<vmem>>, vector<8x128xf32>,
    } else {
    }
    %c1_i32 = arith.constant 1 : i32
    %10 = arith.cmpi eq, %arg0, %c1_i32 : i32
    %11 = arith.extui %10 : i1 to i32
    %c0_i32_6 = arith.constant 0 : i32
    %12 = arith.cmpi ne, %11, %c0_i32_6 : i32
    scf.if %12 {
      %c0_7 = arith.constant 0 : index
      %c0_8 = arith.constant 0 : index
      %13 = vector.load %arg7[%c0_7, %c0_8] : memref<8x128xf32, #tpu.memory_space<vmem>>, vector<8x128xf32>
      %c0_9 = arith.constant 0 : index
      %c0_10 = arith.constant 0 : index
      %14 = vector.load %arg3[%c0_9, %c0_10] : memref<1x128xf32, #tpu.memory_space<vmem>>, vector<1x128xf32>
      %15 = vector.broadcast %14 : vector<1x128xf32> to vector<8x128xf32>
      %16 = arith.addf %13, %15 : vector<8x128xf32>
      %cst_11 = arith.constant 0.000000e+00 : f32
      %17 = vector.broadcast %cst_11 : f32 to vector<8x128xf32>
      %18 = arith.maximumf %16, %17 : vector<8x128xf32>
      %c0_12 = arith.constant 0 : index
      %c0_13 = arith.constant 0 : index
      %19 = vector.load %arg4[%c0_12, %c0_13] : memref<128x2xf32, #tpu.memory_space<vmem>>, vector<128x2xf32>
      %cst_14 = arith.constant dense<0.000000e+00> : vector<8x2xf32>
      %20 = tpu.matmul %18, %19, %cst_14 {dimension_numbers = #tpu.dot_dimension_numbers<[1], [0], [0], [1], [0, 0, 1, 1], [], []>} : vector<8x128xf32>, vector<128x2xf32>, vector<8x2xf32> -> vector<8x2xf32>
      %c0_15 = arith.constant 0 : index
      %c0_16 = arith.constant 0 : index
      %21 = vector.load %arg5[%c0_15, %c0_16] : memref<1x2xf32, #tpu.memory_space<vmem>>, vector<1x2xf32>
      %22 = vector.broadcast %21 : vector<1x2xf32> to vector<8x2xf32>
      %23 = arith.addf %20, %22 : vector<8x2xf32>
      %cst_17 = arith.constant dense<0xFF800000> : vector<8xf32>
      %24 = vector.multi_reduction <maximumf>, %23, %cst_17 [1] : vector<8x2xf32> to vector<8xf32>
      %25 = vector.shape_cast %24 : vector<8xf32> to vector<8x1xf32>
      %26 = vector.broadcast %25 : vector<8x1xf32> to vector<8x2xf32>
      %27 = arith.subf %23, %26 : vector<8x2xf32>
      %28 = math.exp %27 : vector<8x2xf32>
      %cst_18 = arith.constant dense<0.000000e+00> : vector<8xf32>
      %29 = vector.multi_reduction <add>, %28, %cst_18 [1] : vector<8x2xf32> to vector<8xf32>
      %30 = vector.shape_cast %29 : vector<8xf32> to vector<8x1xf32>
      %31 = tpu.reciprocal %30 : vector<8x1xf32> -> vector<8x1xf32>
      %32 = vector.broadcast %31 : vector<8x1xf32> to vector<8x2xf32>
      %33 = arith.mulf %28, %32 : vector<8x2xf32>
      %c0_19 = arith.constant 0 : index
      %c0_20 = arith.constant 0 : index
      %34 = vector.load %arg6[%c0_19, %c0_20] : memref<8x2xf32, #tpu.memory_space<vmem>>, vector<8x2xf32>
      tpu.vector_store %arg6[%c0_19, %c0_20], %33 {strides = array<i32>} : memref<8x2xf32, #tpu.memory_space<vmem>>, vector<8x2xf32>,
    } else {
    }
    return
  }
  func.func @transform_0(%arg0: i32) -> (i32, i32) {
    %c0_i32 = arith.constant 0 : i32
    %c0_i32_0 = arith.constant 0 : i32
    return %c0_i32, %arg0 : i32, i32
  }
  func.func @transform_1(%arg0: i32) -> (i32, i32) {
    %c0_i32 = arith.constant 0 : i32
    %c0_i32_0 = arith.constant 0 : i32
    return %arg0, %c0_i32 : i32, i32
  }
  func.func @transform_2(%arg0: i32) -> (i32, i32) {
    %c0_i32 = arith.constant 0 : i32
    %c0_i32_0 = arith.constant 0 : i32
    %c0_i32_1 = arith.constant 0 : i32
    return %c0_i32, %c0_i32_0 : i32, i32
  }
  func.func @transform_3(%arg0: i32) -> (i32, i32) {
    %c0_i32 = arith.constant 0 : i32
    %c0_i32_0 = arith.constant 0 : i32
    %c0_i32_1 = arith.constant 0 : i32
    return %c0_i32, %c0_i32_0 : i32, i32
  }
  func.func @transform_4(%arg0: i32) -> (i32, i32) {
    %c0_i32 = arith.constant 0 : i32
    %c0_i32_0 = arith.constant 0 : i32
    %c0_i32_1 = arith.constant 0 : i32
    return %c0_i32, %c0_i32_0 : i32, i32
  }
  func.func @transform_5(%arg0: i32) -> (i32, i32) {
    %c0_i32 = arith.constant 0 : i32
    %c0_i32_0 = arith.constant 0 : i32
    %c0_i32_1 = arith.constant 0 : i32
    return %c0_i32, %c0_i32_0 : i32, i32
  }
}

</mosaic_0001>

<bundles_post_ra>
// kernel: netv2_forward.1
= control target key start
LH: loop header
LB: loop body
LE: loop exit
PB: predicated region body
PF: predicated region fallthrough
CT: control target
= control target key end

     0   :  { %10 = vsyncpa [#allocation4], 0  ;;  %s9004_s0 = inlined_call_operand.hbm [shape: f32[8,16384], index: 0, kind: input, shape index: {}]   ;;  %s9005_s1 = inlined_call_operand.hbm [shape: bf16[16384,128], index: 1, kind: input, shape index: {}]   ;;  %s9006_s2 = inlined_call_operand.hbm [shape: f32[1,128], index: 2, kind: input, shape index: {}]   ;;  %s9007_s3 = inlined_call_operand.vmem [shape: f32[128,2], index: 3, kind: input, shape index: {}]   ;;  %s9008_s4 = inlined_call_operand.hbm [shape: f32[1,2], index: 4, kind: input, shape index: {}]   ;;  %s9009_s5 = inlined_call_operand.vmem [shape: f32[8,2], index: 5, kind: output, shape index: {}]  }
   0x1   :  { %12 = vsyncpa [#allocation4 + $0x1], 0 }
   0x2   :  { %13 = vsyncpa [#allocation6], 0 }
   0x3   :  { %15 = vsyncpa [#allocation6 + $0x1], 0 }
   0x4   :  { %16 = vsyncpa [#allocation9], 0  ;;  %s8119_s18 = smov 0   ;;  %s8121_s19 = smov 0  }
   0x5   :  { %s8123_s20 = smov 0   ;;  %s8125_s21 = smov 0  }
   0x6 LB: > { %s8138_s22 = sadd.s32 4294967295, %s8078_s21   ;;  %p42_p0 = scmp.ne.s32.totalorder %s8070_s19, %s8066_s18  ;;  %s8078_s21 = sphi %s8125_s21, %s9027_s21   ;;  %s8074_s20 = sphi %s8123_s20, %s9026_s20   ;;  %s8070_s19 = sphi %s8121_s19, %s9025_s19   ;;  %s8066_s18 = sphi %s8119_s18, %s9024_s18  }
   0x7   : > { %p9010_p1 = scmp.eq.s32.totalorder %s8138_s22, 0  ;;  %p6014_p2 = scmp.ge.s32.totalorder %s8078_s21, 1 }
   0x8   : > { %p163_p3 = scmp.lt.s32.totalorder %s8078_s21, 3  ;;  %s8080_s25 = smov [#allocation7]  }
   0x9   : > { %p8147_p5 = por %p9010_p1, %p42_p0  ;;  %s176_s26 = sshll.u32 %s8080_s25, 4  ;;  %s177_s26 = int_to_ptr.vmem [resolvable:$true] %s176_s26 }
   0xa   : > { %p8151_p6 = pnand %p6014_p2, %p163_p3  ;;  %s8081_s27 = smov [#allocation8]  }
   0xb   : > { %s9013_s23 = scalar_select %p8147_p5, 1, 0 }
   0xc   : > { %s9014_s24 = scalar_select %p8151_p6, 1, 0 }
   0xd   : > { %p7342_p7 = pneg %p8151_p6  ;;  %s190_s28 = sshll.u32 %s8081_s27, 4  ;;  %s8163_s28 = int_to_ptr.vmem [resolvable:$true] %s190_s28 }
   0xe   : > { %s8166_s30 = sadd.s32 1, %s8078_s21   ;;  %s7916_s9 = scalar_lea.hbm %s9006_s2, 16 }
   0xf   : > { %p8159_p8 = pnand %p7342_p7, %p9010_p1  ;;  %s26_s6 = ssub.s32 %s8078_s21, %s8166_s30 }
  0x10   : > { %p7917_p9 = scmp.ne.s32.totalorder %s9006_s2, %s7916_s9  ;;  %p7923_p13 = scmp.lt.u32.totalorder %s7916_s9, %s9006_s2 }
  0x11   : > { %p7918_p10 = pneg %p8159_p8 }
  0x13   : > { %p7919_p11 = pnand %p7918_p10, %p7917_p9 }
  0x15   : > { %p7920_p12 = pneg %p7919_p11 }
  0x17   : > { %p7925_p0 = pnand %p7923_p13, %p7920_p12 }
  0x19   : > { %7928 = shalt.err (!%p7925_p0)
}
  0x1a   : > { %s7929_s14 = scalar_lea.vmem %s177_s26, 16  ;;  %s7936_s15 = scalar_lea.vmem %s177_s26, 32 }
  0x1b   : > { %p7930_p2 = scmp.ne.s32.totalorder %s177_s26, %s7929_s14  ;;  %p7937_p4 = scmp.lt.s32.totalorder %s177_s26, %s177_s26 }
  0x1c   : > { %p7938_p1 = scmp.lt.s32.totalorder %s7936_s15, %s7929_s14 }
  0x1d   : > { %p7932_p3 = pnand %p7930_p2, %p7918_p10 }
  0x1e   : > { %p7939_p5 = por %p7938_p1, %p7937_p4 }
  0x1f   : > { %p7933_p7 = pneg %p7932_p3 }
  0x21   : > { %p7940_p6 = pnand %p7939_p5, %p7933_p7 }
  0x23   : > { %7943 = shalt.err (!%p7940_p6)
}
  0x24   : > { %7345 = dma.hbm_to_vmem [thread:$0]  (!%p8159_p8), %s9006_s2, 16, %s177_s26, [#allocation6]  }
  0x25   : > { %s7944_s27 = scalar_lea.hbm %s9008_s4, 16 }
  0x26   : > { %p7945_p9 = scmp.ne.s32.totalorder %s9008_s4, %s7944_s27  ;;  %p7951_p5 = scmp.lt.u32.totalorder %s7944_s27, %s9008_s4 }
  0x28   : > { %p7947_p1 = pnand %p7945_p9, %p7918_p10 }
  0x2a   : > { %p7948_p4 = pneg %p7947_p1 }
  0x2c   : > { %p7953_p6 = pnand %p7951_p5, %p7948_p4 }
  0x2e   : > { %7956 = shalt.err (!%p7953_p6)
}
  0x2f   : > { %s7957_s26 = scalar_lea.vmem %s8163_s28, 16  ;;  %s7964_s11 = scalar_lea.vmem %s8163_s28, 32 }
  0x30   : > { %p7958_p11 = scmp.ne.s32.totalorder %s8163_s28, %s7957_s26  ;;  %p7965_p0 = scmp.lt.s32.totalorder %s8163_s28, %s8163_s28 }
  0x31   : > { %p7966_p2 = scmp.lt.s32.totalorder %s7964_s11, %s7957_s26 }
  0x32   : > { %p7960_p12 = pnand %p7958_p11, %p7918_p10 }
  0x33   : > { %p7967_p3 = por %p7966_p2, %p7965_p0 }
  0x34   : > { %p7961_p13 = pneg %p7960_p12 }
  0x36   : > { %p7968_p7 = pnand %p7967_p3, %p7961_p13 }
  0x38   : > { %7971 = shalt.err (!%p7968_p7)
}
  0x39   : > { %7348 = dma.hbm_to_vmem [thread:$0]  (!%p8159_p8), %s9008_s4, 16, %s8163_s28, [#allocation9]  }
  0x3a   : > { %p27_p10 = scmp.eq.s32.totalorder %s26_s6, 0  ;;  %s29_s14 = sadd.s32 1, %s8074_s20 }
  0x3b   : > { %p36_p9 = scmp.ne.s32.totalorder %s8074_s20, %s8070_s19  ;;  %p37_p1 = scmp.eq.s32.totalorder %s8078_s21, 0 }
  0x3c   : > { %s8226_s29 = scalar_select %p27_p10, %s8074_s20, %s29_s14  }
  0x3d   : > { %p38_p4 = por %p37_p1, %p36_p9  ;;  %p7358_p5 = scmp.lt.s32.totalorder %s8078_s21, 2 }
  0x3e   : > { %s8230_s15 = sand.u32 1, %s8074_s20   ;;  %s6548_s16 = sshll.u32 %s8078_s21, 13 }
  0x3f   : > { %s6018_s17 = sshll.u32 %s8230_s15, 9  ;;  %s8237_s28 = scalar_lea.hbm %s9004_s0, %s6548_s16 }
  0x40   : > { %s205_s6 = scalar_lea.vmem [#allocation3], %s6018_s17  ;;  %p8239_p8 = pnand %p7358_p5, %p38_p4 }
  0x41   : > { %s213_s27 = sshll.u32 %s205_s6, 4  ;;  %s6021_s8 = sshll.u32 %s8230_s15, 12  ;;  %s8243_s27 = int_to_ptr.vmem [resolvable:$true] %s213_s27 }
  0x42   : > { %s202_s9 = scalar_lea.sflag [#allocation4], %s8230_s15  ;;  %s7972_s10 = scalar_lea.hbm %s8237_s28, 8192 }
  0x43   : > { %p7973_p6 = scmp.ne.s32.totalorder %s8237_s28, %s7972_s10  ;;  %p7974_p11 = pneg %p8239_p8 }
  0x44   : > { %s7977_s12 = scalar_lea.hbm %s9004_s0, 16384  ;;  %p7978_p0 = scmp.lt.u32.totalorder %s8237_s28, %s9004_s0 }
  0x45   : > { %p7975_p12 = pnand %p7974_p11, %p7973_p6  ;;  %p7979_p2 = scmp.lt.u32.totalorder %s7977_s12, %s7972_s10 }
  0x46   : > { %p7981_p7 = scmp.lt.u32.totalorder %s7972_s10, %s8237_s28 }
  0x47   : > { %p7976_p13 = pneg %p7975_p12  ;;  %p7980_p3 = por %p7979_p2, %p7978_p0 }
  0x49   : > { %p7982_p10 = por %p7981_p7, %p7980_p3 }
  0x4b   : > { %p7983_p9 = pnand %p7982_p10, %p7976_p13 }
  0x4d   : > { %7986 = shalt.err (!%p7983_p9)
}
  0x4e   : > { %s7987_s16 = scalar_lea.vmem %s8243_s27, 8192  ;;  %s8082_s17 = smov [#allocation3]  }
  0x4f   : > { %p7988_p1 = scmp.ne.s32.totalorder %s8243_s27, %s7987_s16  ;;  %s7992_s18 = sshll.u32 %s8082_s17, 4  ;;  %s7993_s18 = int_to_ptr.vmem [resolvable:$false] %s7992_s18 }
  0x50   : > { %s7994_s25 = scalar_lea.vmem %s7993_s18, 16384  ;;  %p7995_p6 = scmp.lt.s32.totalorder %s8243_s27, %s7993_s18 }
  0x51   : > { %p7990_p4 = pnand %p7988_p1, %p7974_p11  ;;  %p7996_p12 = scmp.lt.s32.totalorder %s7994_s25, %s7987_s16 }
  0x53   : > { %p7991_p5 = pneg %p7990_p4  ;;  %p7997_p0 = por %p7996_p12, %p7995_p6 }
  0x55   : > { %p7998_p2 = pnand %p7997_p0, %p7991_p5 }
  0x57   : > { %8001 = shalt.err (!%p7998_p2)
}
  0x58   : > { %7352 = dma.hbm_to_vmem [thread:$0]  (!%p8239_p8), %s8237_s28, 8192, %s8243_s27, %s202_s9  }
  0x59   : > { %s224_s6 = scalar_lea.vmem [#allocation5], %s6021_s8  ;;  %s220_s26 = sand.u32 1, %s8078_s21  }
  0x5a   : > { %s231_s10 = sshll.u32 %s224_s6, 4  ;;  %s6549_s11 = sshll.u32 %s8078_s21, 16  ;;  %s8275_s10 = int_to_ptr.vmem [resolvable:$true] %s231_s10 }
  0x5b   : > { %s8281_s14 = scalar_lea.hbm %s9005_s1, %s6549_s11  ;;  %s8283_s16 = scalar_lea.sflag [#allocation6], %s220_s26 }
  0x5c   : > { %s8002_s17 = scalar_lea.hbm %s8281_s14, 65536  ;;  %s8007_s21 = scalar_lea.hbm %s9005_s1, 131072 }
  0x5d   : > { %p8003_p13 = scmp.ne.s32.totalorder %s8281_s14, %s8002_s17  ;;  %p8008_p10 = scmp.lt.u32.totalorder %s8281_s14, %s9005_s1 }
  0x5e   : > { %p8009_p9 = scmp.lt.u32.totalorder %s8007_s21, %s8002_s17  ;;  %p8011_p4 = scmp.lt.u32.totalorder %s8002_s17, %s8281_s14 }
  0x5f   : > { %p8005_p3 = pnand %p8003_p13, %p7974_p11 }
  0x60   : > { %p8010_p1 = por %p8009_p9, %p8008_p10 }
  0x61   : > { %p8006_p7 = pneg %p8005_p3 }
  0x62   : > { %p8012_p5 = por %p8011_p4, %p8010_p1 }
  0x64   : > { %p8013_p6 = pnand %p8012_p5, %p8006_p7 }
  0x66   : > { %8016 = shalt.err (!%p8013_p6)
}
  0x67   : > { %s8017_s9 = scalar_lea.vmem %s8275_s10, 65536  ;;  %s8083_s18 = smov [#allocation5]  }
  0x68   : > { %p8018_p12 = scmp.ne.s32.totalorder %s8275_s10, %s8017_s9  ;;  %s8022_s25 = sshll.u32 %s8083_s18, 4  ;;  %s8023_s25 = int_to_ptr.vmem [resolvable:$false] %s8022_s25 }
  0x69   : > { %s8024_s6 = scalar_lea.vmem %s8023_s25, 131072  ;;  %p8025_p13 = scmp.lt.s32.totalorder %s8275_s10, %s8023_s25 }
  0x6a   : > { %p8020_p0 = pnand %p8018_p12, %p7974_p11  ;;  %p8026_p3 = scmp.lt.s32.totalorder %s8024_s6, %s8017_s9 }
  0x6c   : > { %p8021_p2 = pneg %p8020_p0  ;;  %p8027_p10 = por %p8026_p3, %p8025_p13 }
  0x6e   : > { %p8028_p9 = pnand %p8027_p10, %p8021_p2 }
  0x70   : > { %8031 = shalt.err (!%p8028_p9)
}
  0x71   : > { %s8084_s26 = smov 64   ;;  %s8085_s11 = smov 4  }
  0x72   : > { %7355 = dma.hbm_to_vmem [thread:$0]  (!%p8239_p8), %s8281_s14, 65536, %s8275_s10, %s8283_s16, %s8084_s26, %s8084_s26, %s8085_s11  }
  0x73   : > { %p9017_p11 = scmp.ne.s32.totalorder %s9014_s24, 0 }
  0x74   : > { %s245_s12 = sand.u32 (!%p9017_p11), 1, %s8070_s19   ;;  %p9018_p7 = scmp.ne.s32.totalorder (!%p9017_p11), %s9013_s23, 0 }
  0x75   : > { %243 = sbr.rel (%p9017_p11) target bundleno = 1443 (0x5a3), region = 40  ;;  %s6025_s13 = sshll.u32 (!%p9017_p11), %s245_s12, 9 }
  0x76   : > { %s246_s17 = scalar_lea.sflag (!%p9017_p11), [#allocation4], %s245_s12  ;;  %s8312_s15 = scalar_lea.vmem (!%p9017_p11), [#allocation3], %s6025_s13 }
  0x7c   : > { %8049 = dma.done.wait (%p9018_p7), %s246_s17, 8192  }
  0x7d   : > { %8051 = vsyncadd (%p9018_p7), %s246_s17, 4294959104  ;;  %s254_s28 = sand.u32 1, %s8138_s22   ;;  %s6026_s7 = sshll.u32 %s245_s12, 12 }
  0x7e   : > { %s255_s10 = scalar_lea.sflag [#allocation6], %s254_s28  ;;  %s8319_s14 = scalar_lea.vmem [#allocation5], %s6026_s7 }
  0x7f   : > { %8053 = dma.done.wait (%p9018_p7), %s255_s10, 65536  }
  0x80   : > { %8055 = vsyncadd (%p9018_p7), %s255_s10, 4294901760  ;;  %p9019_p8 = scmp.eq.s32.totalorder %s8138_s22, 0 }
  0x82   : > { %8057 = dma.done.wait (%p9019_p8), [#allocation6], 16   ;;  %p9020_p1 = pmov %p9019_p8 }
  0x84   : > { %8059 = vsyncadd (%p9020_p1), [#allocation6], 4294967280  ;;  %p9021_p4 = pmov %p9020_p1 }
  0x85   : > { %p9022_p5 = pmov %p9020_p1 }
  0x86   : > { %8061 = dma.done.wait (%p9021_p4), [#allocation9], 16  }
  0x87   : > { %8063 = vsyncadd (%p9022_p5), [#allocation9], 4294967280  ;;  %v7400_v0 = vld [vmem:[%s8319_s14 + $0x40] sm:$0xff]   ;;  %v7404_v4 = vld [vmem:[%s8319_s14 + $0x48] sm:$0xff]   ;;  %p9023_p6 = scmp.ne.s32.totalorder %s8138_s22, 0 }
  0x88   : > { %v7401_v1 = vld [vmem:[%s8319_s14 + $0xc0] sm:$0xff]   ;;  %6550 = vmatprep.subr.bf16.mxu0 %v7400_v0  ;;  %v7405_v5 = vld [vmem:[%s8319_s14 + $0xc8] sm:$0xff]   ;;  %v7408_v8 = vld [vmem:[%s8319_s14 + $0x50] sm:$0xff]  }
  0x89   : > { %v7402_v2 = vld [vmem:[%s8319_s14] sm:$0xff]   ;;  %6572 = vmatprep.subr.bf16.mxu1 %v7401_v1  ;;  %v7406_v6 = vld [vmem:[%s8319_s14 + $0x8] sm:$0xff]   ;;  %v7409_v9 = vld [vmem:[%s8319_s14 + $0xd0] sm:$0xff]  }
  0x8a   : > { %v7403_v3 = vld [vmem:[%s8319_s14 + $0x80] sm:$0xff]   ;;  %6551 = vmatpush3.bf16.msra.mxu0 %v7402_v2  ;;  %v7407_v7 = vld [vmem:[%s8319_s14 + $0x88] sm:$0xff]   ;;  %v7410_v10 = vld [vmem:[%s8319_s14 + $0x10] sm:$0xff]  }
  0x8b   : > { %6573 = vmatpush3.bf16.msra.mxu1 %v7403_v3  ;;  %6552 = vmatprep.subr.bf16.mxu0 %v7404_v4  ;;  %v7411_v11 = vld [vmem:[%s8319_s14 + $0x90] sm:$0xff]   ;;  %v7412_v12 = vld [vmem:[%s8319_s14 + $0x58] sm:$0xff]   ;;  %v7416_v16 = vld [vmem:[%s8319_s14 + $0x60] sm:$0xff]  }
  0x8c   : > { %6574 = vmatprep.subr.bf16.mxu1 %v7405_v5  ;;  %v7413_v13 = vld [vmem:[%s8319_s14 + $0xd8] sm:$0xff]   ;;  %v7417_v17 = vld [vmem:[%s8319_s14 + $0xe0] sm:$0xff]   ;;  %v7420_v20 = vld [vmem:[%s8319_s14 + $0x68] sm:$0xff]  }
  0x8d   : > { %v7414_v14 = vld [vmem:[%s8319_s14 + $0x18] sm:$0xff]   ;;  %v7418_v18 = vld [vmem:[%s8319_s14 + $0x20] sm:$0xff]   ;;  %v7421_v21 = vld [vmem:[%s8319_s14 + $0xe8] sm:$0xff]  }
  0x8e   : > { %6553 = vmatpush3.bf16.msra.mxu0 %v7406_v6  ;;  %v7415_v15 = vld [vmem:[%s8319_s14 + $0x98] sm:$0xff]   ;;  %v7419_v19 = vld [vmem:[%s8319_s14 + $0xa0] sm:$0xff]   ;;  %v7422_v22 = vld [vmem:[%s8319_s14 + $0x28] sm:$0xff]  }
  0x8f   : > { %6575 = vmatpush3.bf16.msra.mxu1 %v7407_v7  ;;  %6554 = vmatprep.subr.bf16.mxu0 %v7408_v8  ;;  %v7423_v23 = vld [vmem:[%s8319_s14 + $0xa8] sm:$0xff]   ;;  %v7424_v24 = vld [vmem:[%s8319_s14 + $0x70] sm:$0xff]   ;;  %v7428_v28 = vld [vmem:[%s8319_s14 + $0x78] sm:$0xff]  }
  0x90   : > { %6576 = vmatprep.subr.bf16.mxu1 %v7409_v9  ;;  %v7425_v25 = vld [vmem:[%s8319_s14 + $0xf0] sm:$0xff]   ;;  %v7429_v29 = vld [vmem:[%s8319_s14 + $0xf8] sm:$0xff]   ;;  %v297_v32 = vld [vmem:[%s8312_s15 + $0x8] sm:$0xff] }
  0x91   : > { %v7426_v26 = vld [vmem:[%s8319_s14 + $0x30] sm:$0xff]   ;;  %v7430_v30 = vld [vmem:[%s8319_s14 + $0x38] sm:$0xff]   ;;  %v296_v34 = vld [vmem:[%s8312_s15] sm:$0xff]  ;;  %v361_v35 = vpack.c.bf16 %v297_v32, %v297_v32 }
  0x92   : > { %6555 = vmatpush3.bf16.msra.mxu0 %v7410_v10  ;;  %v7427_v27 = vld [vmem:[%s8319_s14 + $0xb0] sm:$0xff]   ;;  %v7431_v31 = vld [vmem:[%s8319_s14 + $0xb8] sm:$0xff]   ;;  %v360_v37 = vpack.c.bf16 %v296_v34, %v296_v34  ;;  %v7432_v40 = vld [vmem:[%s8319_s14 + $0x140] sm:$0xff]  }
  0x93   : > { %6577 = vmatpush3.bf16.msra.mxu1 %v7411_v11  ;;  %6556 = vmatprep.subr.bf16.mxu0 %v7412_v12  ;;  %v299_v33 = vld [vmem:[%s8312_s15 + $0x18] sm:$0xff]  ;;  %v298_v38 = vld [vmem:[%s8312_s15 + $0x10] sm:$0xff]  ;;  %v7433_v41 = vld [vmem:[%s8319_s14 + $0x1c0] sm:$0xff]  }
  0x94   : > { %6578 = vmatprep.subr.bf16.mxu1 %v7413_v13  ;;  %v363_v36 = vpack.c.bf16 %v299_v33, %v299_v33  ;;  %v362_v39 = vpack.c.bf16 %v298_v38, %v298_v38  ;;  %4552 = vmatprep.mubr.bf16.mxu0 %v361_v35  ;;  %v7434_v42 = vld [vmem:[%s8319_s14 + $0x100] sm:$0xff]   ;;  %v7436_v44 = vld [vmem:[%s8319_s14 + $0x148] sm:$0xff]   ;;  %v7440_v48 = vld [vmem:[%s8319_s14 + $0x150] sm:$0xff]  }
  0x95   : > { %v7435_v43 = vld [vmem:[%s8319_s14 + $0x180] sm:$0xff]   ;;  %v7437_v45 = vld [vmem:[%s8319_s14 + $0x1c8] sm:$0xff]   ;;  %v7441_v49 = vld [vmem:[%s8319_s14 + $0x1d0] sm:$0xff]  }
  0x96   : > { %6557 = vmatpush3.bf16.msra.mxu0 %v7414_v14  ;;  %4592 = vmatprep.mubr.bf16.mxu1 %v363_v36  ;;  %v7438_v46 = vld [vmem:[%s8319_s14 + $0x108] sm:$0xff]   ;;  %v7442_v50 = vld [vmem:[%s8319_s14 + $0x110] sm:$0xff]   ;;  %v7444_v52 = vld [vmem:[%s8319_s14 + $0x158] sm:$0xff]  }
  0x97   : > { %6579 = vmatpush3.bf16.msra.mxu1 %v7415_v15  ;;  %6558 = vmatprep.subr.bf16.mxu0 %v7416_v16  ;;  %v7439_v47 = vld [vmem:[%s8319_s14 + $0x188] sm:$0xff]   ;;  %v7443_v51 = vld [vmem:[%s8319_s14 + $0x190] sm:$0xff]   ;;  %v7445_v53 = vld [vmem:[%s8319_s14 + $0x1d8] sm:$0xff]  }
  0x98   : > { %6580 = vmatprep.subr.bf16.mxu1 %v7417_v17  ;;  %v7446_v54 = vld [vmem:[%s8319_s14 + $0x118] sm:$0xff]   ;;  %v7448_v56 = vld [vmem:[%s8319_s14 + $0x160] sm:$0xff]   ;;  %v7452_v60 = vld [vmem:[%s8319_s14 + $0x168] sm:$0xff]  }
  0x99   : > { %v7447_v55 = vld [vmem:[%s8319_s14 + $0x198] sm:$0xff]   ;;  %v7449_v57 = vld [vmem:[%s8319_s14 + $0x1e0] sm:$0xff]   ;;  %v7453_v61 = vld [vmem:[%s8319_s14 + $0x1e8] sm:$0xff]  }
  0x9a   : > { %6559 = vmatpush3.bf16.msra.mxu0 %v7418_v18  ;;  %v7450_v58 = vld [vmem:[%s8319_s14 + $0x120] sm:$0xff]   ;;  %v7454_v62 = vld [vmem:[%s8319_s14 + $0x128] sm:$0xff]   ;;  %v7456_v0 = vld [vmem:[%s8319_s14 + $0x170] sm:$0xff]  }
  0x9b   : > { %6581 = vmatpush3.bf16.msra.mxu1 %v7419_v19  ;;  %6560 = vmatprep.subr.bf16.mxu0 %v7420_v20  ;;  %v7451_v59 = vld [vmem:[%s8319_s14 + $0x1a0] sm:$0xff]   ;;  %v7455_v63 = vld [vmem:[%s8319_s14 + $0x1a8] sm:$0xff]   ;;  %v7457_v1 = vld [vmem:[%s8319_s14 + $0x1f0] sm:$0xff]  }
  0x9c   : > { %6582 = vmatprep.subr.bf16.mxu1 %v7421_v21  ;;  %v7458_v2 = vld [vmem:[%s8319_s14 + $0x130] sm:$0xff]   ;;  %v7460_v4 = vld [vmem:[%s8319_s14 + $0x178] sm:$0xff]   ;;  %v301_v8 = vld [vmem:[%s8312_s15 + $0x28] sm:$0xff] }
  0x9d   : > { %v7459_v3 = vld [vmem:[%s8319_s14 + $0x1b0] sm:$0xff]   ;;  %v7461_v5 = vld [vmem:[%s8319_s14 + $0x1f8] sm:$0xff]   ;;  %v365_v10 = vpack.c.bf16 %v301_v8, %v301_v8  ;;  %v300_v12 = vld [vmem:[%s8312_s15 + $0x20] sm:$0xff] }
  0x9e   : > { %6561 = vmatpush3.bf16.msra.mxu0 %v7422_v22  ;;  %v7462_v6 = vld [vmem:[%s8319_s14 + $0x138] sm:$0xff]   ;;  %v302_v13 = vld [vmem:[%s8312_s15 + $0x30] sm:$0xff]  ;;  %v364_v14 = vpack.c.bf16 %v300_v12, %v300_v12  ;;  %v7464_v16 = vld [vmem:[%s8319_s14 + $0x240] sm:$0xff]  }
  0x9f   : > { %6583 = vmatpush3.bf16.msra.mxu1 %v7423_v23  ;;  %6562 = vmatprep.subr.bf16.mxu0 %v7424_v24  ;;  %v7463_v7 = vld [vmem:[%s8319_s14 + $0x1b8] sm:$0xff]   ;;  %v366_v15 = vpack.c.bf16 %v302_v13, %v302_v13  ;;  %v7465_v17 = vld [vmem:[%s8319_s14 + $0x2c0] sm:$0xff]   ;;  %v7468_v20 = vld [vmem:[%s8319_s14 + $0x248] sm:$0xff]  }
  0xa0   : > { %6584 = vmatprep.subr.bf16.mxu1 %v7425_v25  ;;  %v303_v9 = vld [vmem:[%s8312_s15 + $0x38] sm:$0xff]  ;;  %v7466_v18 = vld [vmem:[%s8319_s14 + $0x200] sm:$0xff]   ;;  %v7469_v21 = vld [vmem:[%s8319_s14 + $0x2c8] sm:$0xff]  }
  0xa1   : > { %v367_v11 = vpack.c.bf16 %v303_v9, %v303_v9  ;;  %v7467_v19 = vld [vmem:[%s8319_s14 + $0x280] sm:$0xff]   ;;  %v7470_v22 = vld [vmem:[%s8319_s14 + $0x208] sm:$0xff]   ;;  %v7472_v24 = vld [vmem:[%s8319_s14 + $0x250] sm:$0xff]  }
  0xa2   : > { %6563 = vmatpush3.bf16.msra.mxu0 %v7426_v26  ;;  %v7471_v23 = vld [vmem:[%s8319_s14 + $0x288] sm:$0xff]   ;;  %v7473_v25 = vld [vmem:[%s8319_s14 + $0x2d0] sm:$0xff]   ;;  %v7480_v32 = vld [vmem:[%s8319_s14 + $0x260] sm:$0xff]  }
  0xa3   : > { %6585 = vmatpush3.bf16.msra.mxu1 %v7427_v27  ;;  %6564 = vmatprep.subr.bf16.mxu0 %v7428_v28  ;;  %v7474_v26 = vld [vmem:[%s8319_s14 + $0x210] sm:$0xff]   ;;  %v7476_v28 = vld [vmem:[%s8319_s14 + $0x258] sm:$0xff]   ;;  %v7481_v33 = vld [vmem:[%s8319_s14 + $0x2e0] sm:$0xff]  }
  0xa4   : > { %6586 = vmatprep.subr.bf16.mxu1 %v7429_v29  ;;  %v7475_v27 = vld [vmem:[%s8319_s14 + $0x290] sm:$0xff]   ;;  %v7477_v29 = vld [vmem:[%s8319_s14 + $0x2d8] sm:$0xff]   ;;  %v7482_v34 = vld [vmem:[%s8319_s14 + $0x220] sm:$0xff]  }
  0xa5   : > { %v7483_v35 = vld [vmem:[%s8319_s14 + $0x2a0] sm:$0xff]   ;;  %v7484_v36 = vld [vmem:[%s8319_s14 + $0x268] sm:$0xff]  }
  0xa6   : > { %6565 = vmatpush3.bf16.msra.mxu0 %v7430_v30  ;;  %v7478_v30 = vld [vmem:[%s8319_s14 + $0x218] sm:$0xff]   ;;  %v7486_v38 = vld [vmem:[%s8319_s14 + $0x228] sm:$0xff]   ;;  %v7512_v8 = vld [vmem:[%s8319_s14 + $0x360] sm:$0xff]  }
  0xa7   : > { %6587 = vmatpush3.bf16.msra.mxu1 %v7431_v31  ;;  %6594 = vmatprep.subr.bf16.mxu0 %v7432_v40  ;;  %v7479_v31 = vld [vmem:[%s8319_s14 + $0x298] sm:$0xff]   ;;  %v7488_v40 = vld [vmem:[%s8319_s14 + $0x270] sm:$0xff]   ;;  %v7513_v9 = vld [vmem:[%s8319_s14 + $0x3e0] sm:$0xff]  }
  0xa8   : > { %6616 = vmatprep.subr.bf16.mxu1 %v7433_v41  ;;  %v7489_v41 = vld [vmem:[%s8319_s14 + $0x2f0] sm:$0xff]   ;;  %v7516_v12 = vld [vmem:[%s8319_s14 + $0x368] sm:$0xff]  }
  0xa9   : > { %4553 = vmatmul.mubr.bf16.vlgmr.msra.gmra.mrb[0].mxu0 %v360_v37  ;;  %v7485_v37 = vld [vmem:[%s8319_s14 + $0x2e8] sm:$0xff]  }
  0xaa   : > { %4593 = vmatmul.mubr.bf16.vlgmr.msra.gmra.mrb[0].mxu1 %v362_v39  ;;  %6595 = vmatpush3.bf16.msra.mxu0 %v7434_v42  ;;  %v7487_v39 = vld [vmem:[%s8319_s14 + $0x2a8] sm:$0xff]   ;;  %v7490_v42 = vld [vmem:[%s8319_s14 + $0x230] sm:$0xff]  }
  0xab   : > { %6617 = vmatpush3.bf16.msra.mxu1 %v7435_v43  ;;  %6596 = vmatprep.subr.bf16.mxu0 %v7436_v44  ;;  %v7491_v43 = vld [vmem:[%s8319_s14 + $0x2b0] sm:$0xff]   ;;  %v7492_v44 = vld [vmem:[%s8319_s14 + $0x278] sm:$0xff]   ;;  %v7517_v13 = vld [vmem:[%s8319_s14 + $0x3e8] sm:$0xff]  }
  0xac   : > { %6618 = vmatprep.subr.bf16.mxu1 %v7437_v45  ;;  %4632 = vmatprep.mubr.bf16.mxu0 %v365_v10  ;;  %v7493_v45 = vld [vmem:[%s8319_s14 + $0x2f8] sm:$0xff]   ;;  %v7514_v10 = vld [vmem:[%s8319_s14 + $0x320] sm:$0xff]  }
  0xad   : > { %4672 = vmatprep.mubr.bf16.mxu1 %v367_v11  ;;  %v7515_v11 = vld [vmem:[%s8319_s14 + $0x3a0] sm:$0xff]  }
  0xae   : > { %6597 = vmatpush3.bf16.msra.mxu0 %v7438_v46  ;;  %v7494_v46 = vld [vmem:[%s8319_s14 + $0x238] sm:$0xff]  }
  0xaf   : > { %6619 = vmatpush3.bf16.msra.mxu1 %v7439_v47  ;;  %6598 = vmatprep.subr.bf16.mxu0 %v7440_v48  ;;  %v7495_v47 = vld [vmem:[%s8319_s14 + $0x2b8] sm:$0xff]   ;;  %v305_v48 = vld [vmem:[%s8312_s15 + $0x48] sm:$0xff] }
  0xb0   : > { %6620 = vmatprep.subr.bf16.mxu1 %v7441_v49  ;;  %v369_v49 = vpack.c.bf16 %v305_v48, %v305_v48  ;;  %v7544_v48 = vld [vmem:[%s8319_s14 + $0x460] sm:$0xff]  }
  0xb2   : > { %6599 = vmatpush3.bf16.msra.mxu0 %v7442_v50  ;;  %v307_v50 = vld [vmem:[%s8312_s15 + $0x58] sm:$0xff] }
  0xb3   : > { %6621 = vmatpush3.bf16.msra.mxu1 %v7443_v51  ;;  %6600 = vmatprep.subr.bf16.mxu0 %v7444_v52  ;;  %v304_v51 = vld [vmem:[%s8312_s15 + $0x40] sm:$0xff]  ;;  %v306_v52 = vld [vmem:[%s8312_s15 + $0x50] sm:$0xff] }
  0xb4   : > { %6622 = vmatprep.subr.bf16.mxu1 %v7445_v53  ;;  %v371_v53 = vpack.c.bf16 %v307_v50, %v307_v50  ;;  %v7546_v50 = vld [vmem:[%s8319_s14 + $0x420] sm:$0xff]  }
  0xb6   : > { %6601 = vmatpush3.bf16.msra.mxu0 %v7446_v54  ;;  %v368_v54 = vpack.c.bf16 %v304_v51, %v304_v51  ;;  %v7547_v51 = vld [vmem:[%s8319_s14 + $0x4a0] sm:$0xff]  }
  0xb7   : > { %6623 = vmatpush3.bf16.msra.mxu1 %v7447_v55  ;;  %6602 = vmatprep.subr.bf16.mxu0 %v7448_v56  ;;  %v370_v55 = vpack.c.bf16 %v306_v52, %v306_v52  ;;  %v7496_v56 = vld [vmem:[%s8319_s14 + $0x340] sm:$0xff]   ;;  %v7548_v52 = vld [vmem:[%s8319_s14 + $0x468] sm:$0xff]  }
  0xb8   : > { %6624 = vmatprep.subr.bf16.mxu1 %v7449_v57  ;;  %v7497_v57 = vld [vmem:[%s8319_s14 + $0x3c0] sm:$0xff]  }
  0xba   : > { %6603 = vmatpush3.bf16.msra.mxu0 %v7450_v58  ;;  %v7498_v58 = vld [vmem:[%s8319_s14 + $0x300] sm:$0xff]  }
  0xbb   : > { %6625 = vmatpush3.bf16.msra.mxu1 %v7451_v59  ;;  %6604 = vmatprep.subr.bf16.mxu0 %v7452_v60  ;;  %v7499_v59 = vld [vmem:[%s8319_s14 + $0x380] sm:$0xff]   ;;  %v7500_v60 = vld [vmem:[%s8319_s14 + $0x348] sm:$0xff]  }
  0xbc   : > { %6626 = vmatprep.subr.bf16.mxu1 %v7453_v61  ;;  %v7501_v61 = vld [vmem:[%s8319_s14 + $0x3c8] sm:$0xff]  }
  0xbe   : > { %6605 = vmatpush3.bf16.msra.mxu0 %v7454_v62  ;;  %v7502_v62 = vld [vmem:[%s8319_s14 + $0x308] sm:$0xff]  }
  0xbf   : > { %6627 = vmatpush3.bf16.msra.mxu1 %v7455_v63  ;;  %6606 = vmatprep.subr.bf16.mxu0 %v7456_v0  ;;  %v7503_v63 = vld [vmem:[%s8319_s14 + $0x388] sm:$0xff]   ;;  %v7504_v0 = vld [vmem:[%s8319_s14 + $0x350] sm:$0xff]  }
  0xc0   : > { %6628 = vmatprep.subr.bf16.mxu1 %v7457_v1  ;;  %v7505_v1 = vld [vmem:[%s8319_s14 + $0x3d0] sm:$0xff]  }
  0xc2   : > { %6607 = vmatpush3.bf16.msra.mxu0 %v7458_v2  ;;  %v7506_v2 = vld [vmem:[%s8319_s14 + $0x310] sm:$0xff]  }
  0xc3   : > { %6629 = vmatpush3.bf16.msra.mxu1 %v7459_v3  ;;  %6608 = vmatprep.subr.bf16.mxu0 %v7460_v4  ;;  %v7507_v3 = vld [vmem:[%s8319_s14 + $0x390] sm:$0xff]   ;;  %v7508_v4 = vld [vmem:[%s8319_s14 + $0x358] sm:$0xff]  }
  0xc4   : > { %6630 = vmatprep.subr.bf16.mxu1 %v7461_v5  ;;  %v7509_v5 = vld [vmem:[%s8319_s14 + $0x3d8] sm:$0xff]  }
  0xc6   : > { %6609 = vmatpush3.bf16.msra.mxu0 %v7462_v6  ;;  %v7510_v6 = vld [vmem:[%s8319_s14 + $0x318] sm:$0xff]  }
  0xc7   : > { %6631 = vmatpush3.bf16.msra.mxu1 %v7463_v7  ;;  %6638 = vmatprep.subr.bf16.mxu0 %v7464_v16  ;;  %v7511_v7 = vld [vmem:[%s8319_s14 + $0x398] sm:$0xff]   ;;  %v7520_v16 = vld [vmem:[%s8319_s14 + $0x370] sm:$0xff]  }
  0xc8   : > { %6660 = vmatprep.subr.bf16.mxu1 %v7465_v17  ;;  %v7521_v17 = vld [vmem:[%s8319_s14 + $0x3f0] sm:$0xff]  }
  0xc9   : > { %4633 = vmatmul.mubr.bf16.vlgmr.msra.gmra.mrb[4].mxu0 %v364_v14  ;;  %v7518_v14 = vld [vmem:[%s8319_s14 + $0x328] sm:$0xff]  }
  0xca   : > { %4673 = vmatmul.mubr.bf16.vlgmr.msra.gmra.mrb[4].mxu1 %v366_v15  ;;  %6639 = vmatpush3.bf16.msra.mxu0 %v7466_v18  ;;  %v7519_v15 = vld [vmem:[%s8319_s14 + $0x3a8] sm:$0xff]   ;;  %v7522_v18 = vld [vmem:[%s8319_s14 + $0x330] sm:$0xff]  }
  0xcb   : > { %6661 = vmatpush3.bf16.msra.mxu1 %v7467_v19  ;;  %6640 = vmatprep.subr.bf16.mxu0 %v7468_v20  ;;  %v7523_v19 = vld [vmem:[%s8319_s14 + $0x3b0] sm:$0xff]   ;;  %v7524_v20 = vld [vmem:[%s8319_s14 + $0x378] sm:$0xff]  }
  0xcc   : > { %6662 = vmatprep.subr.bf16.mxu1 %v7469_v21  ;;  %4712 = vmatprep.mubr.bf16.mxu0 %v369_v49  ;;  %v7525_v21 = vld [vmem:[%s8319_s14 + $0x3f8] sm:$0xff]   ;;  %v7545_v49 = vld [vmem:[%s8319_s14 + $0x4e0] sm:$0xff]  }
  0xcd   : > { %4752 = vmatprep.mubr.bf16.mxu1 %v371_v53  ;;  %v7549_v53 = vld [vmem:[%s8319_s14 + $0x4e8] sm:$0xff]  }
  0xce   : > { %6641 = vmatpush3.bf16.msra.mxu0 %v7470_v22  ;;  %v7526_v22 = vld [vmem:[%s8319_s14 + $0x338] sm:$0xff]  }
  0xcf   : > { %6663 = vmatpush3.bf16.msra.mxu1 %v7471_v23  ;;  %6642 = vmatprep.subr.bf16.mxu0 %v7472_v24  ;;  %v7527_v23 = vld [vmem:[%s8319_s14 + $0x3b8] sm:$0xff]   ;;  %v309_v24 = vld [vmem:[%s8312_s15 + $0x68] sm:$0xff] }
  0xd0   : > { %6664 = vmatprep.subr.bf16.mxu1 %v7473_v25  ;;  %v311_v25 = vld [vmem:[%s8312_s15 + $0x78] sm:$0xff] }
  0xd2   : > { %6643 = vmatpush3.bf16.msra.mxu0 %v7474_v26  ;;  %v308_v26 = vld [vmem:[%s8312_s15 + $0x60] sm:$0xff] }
  0xd3   : > { %6665 = vmatpush3.bf16.msra.mxu1 %v7475_v27  ;;  %6644 = vmatprep.subr.bf16.mxu0 %v7476_v28  ;;  %v373_v27 = vpack.c.bf16 %v309_v24, %v309_v24  ;;  %v375_v28 = vpack.c.bf16 %v311_v25, %v311_v25  ;;  %v7576_v24 = vld [vmem:[%s8319_s14 + $0x560] sm:$0xff]  }
  0xd4   : > { %6666 = vmatprep.subr.bf16.mxu1 %v7477_v29  ;;  %v372_v29 = vpack.c.bf16 %v308_v26, %v308_v26  ;;  %v7577_v25 = vld [vmem:[%s8319_s14 + $0x5e0] sm:$0xff]  }
  0xd5   : > { %v7578_v26 = vld [vmem:[%s8319_s14 + $0x520] sm:$0xff]  }
  0xd6   : > { %6645 = vmatpush3.bf16.msra.mxu0 %v7478_v30  ;;  %v310_v30 = vld [vmem:[%s8312_s15 + $0x70] sm:$0xff] }
  0xd7   : > { %6667 = vmatpush3.bf16.msra.mxu1 %v7479_v31  ;;  %6646 = vmatprep.subr.bf16.mxu0 %v7480_v32  ;;  %v374_v31 = vpack.c.bf16 %v310_v30, %v310_v30  ;;  %v7528_v32 = vld [vmem:[%s8319_s14 + $0x440] sm:$0xff]   ;;  %v7582_v30 = vld [vmem:[%s8319_s14 + $0x528] sm:$0xff]  }
  0xd8   : > { %6668 = vmatprep.subr.bf16.mxu1 %v7481_v33  ;;  %v7529_v33 = vld [vmem:[%s8319_s14 + $0x4c0] sm:$0xff]  }
  0xda   : > { %6647 = vmatpush3.bf16.msra.mxu0 %v7482_v34  ;;  %v7530_v34 = vld [vmem:[%s8319_s14 + $0x400] sm:$0xff]  }
  0xdb   : > { %6669 = vmatpush3.bf16.msra.mxu1 %v7483_v35  ;;  %6648 = vmatprep.subr.bf16.mxu0 %v7484_v36  ;;  %v7531_v35 = vld [vmem:[%s8319_s14 + $0x480] sm:$0xff]   ;;  %v7532_v36 = vld [vmem:[%s8319_s14 + $0x448] sm:$0xff]  }
  0xdc   : > { %6670 = vmatprep.subr.bf16.mxu1 %v7485_v37  ;;  %v7533_v37 = vld [vmem:[%s8319_s14 + $0x4c8] sm:$0xff]  }
  0xde   : > { %6649 = vmatpush3.bf16.msra.mxu0 %v7486_v38  ;;  %v7534_v38 = vld [vmem:[%s8319_s14 + $0x408] sm:$0xff]  }
  0xdf   : > { %6671 = vmatpush3.bf16.msra.mxu1 %v7487_v39  ;;  %6650 = vmatprep.subr.bf16.mxu0 %v7488_v40  ;;  %v7535_v39 = vld [vmem:[%s8319_s14 + $0x488] sm:$0xff]   ;;  %v7536_v40 = vld [vmem:[%s8319_s14 + $0x450] sm:$0xff]  }
  0xe0   : > { %6672 = vmatprep.subr.bf16.mxu1 %v7489_v41  ;;  %v7537_v41 = vld [vmem:[%s8319_s14 + $0x4d0] sm:$0xff]  }
  0xe2   : > { %6651 = vmatpush3.bf16.msra.mxu0 %v7490_v42  ;;  %v7538_v42 = vld [vmem:[%s8319_s14 + $0x410] sm:$0xff]  }
  0xe3   : > { %6673 = vmatpush3.bf16.msra.mxu1 %v7491_v43  ;;  %6652 = vmatprep.subr.bf16.mxu0 %v7492_v44  ;;  %v7539_v43 = vld [vmem:[%s8319_s14 + $0x490] sm:$0xff]   ;;  %v7540_v44 = vld [vmem:[%s8319_s14 + $0x458] sm:$0xff]  }
  0xe4   : > { %6674 = vmatprep.subr.bf16.mxu1 %v7493_v45  ;;  %v7541_v45 = vld [vmem:[%s8319_s14 + $0x4d8] sm:$0xff]  }
  0xe6   : > { %6653 = vmatpush3.bf16.msra.mxu0 %v7494_v46  ;;  %v7542_v46 = vld [vmem:[%s8319_s14 + $0x418] sm:$0xff]  }
  0xe7   : > { %6675 = vmatpush3.bf16.msra.mxu1 %v7495_v47  ;;  %6682 = vmatprep.subr.bf16.mxu0 %v7496_v56  ;;  %v7543_v47 = vld [vmem:[%s8319_s14 + $0x498] sm:$0xff]   ;;  %v7552_v56 = vld [vmem:[%s8319_s14 + $0x470] sm:$0xff]  }
  0xe8   : > { %6704 = vmatprep.subr.bf16.mxu1 %v7497_v57  ;;  %v7553_v57 = vld [vmem:[%s8319_s14 + $0x4f0] sm:$0xff]  }
  0xe9   : > { %4713 = vmatmul.mubr.bf16.vlgmr.msra.gmra.mrb[8].mxu0 %v368_v54  ;;  %v7550_v54 = vld [vmem:[%s8319_s14 + $0x428] sm:$0xff]  }
  0xea   : > { %4753 = vmatmul.mubr.bf16.vlgmr.msra.gmra.mrb[8].mxu1 %v370_v55  ;;  %6683 = vmatpush3.bf16.msra.mxu0 %v7498_v58  ;;  %v7551_v55 = vld [vmem:[%s8319_s14 + $0x4a8] sm:$0xff]   ;;  %v7554_v58 = vld [vmem:[%s8319_s14 + $0x430] sm:$0xff]  }
  0xeb   : > { %6705 = vmatpush3.bf16.msra.mxu1 %v7499_v59  ;;  %6684 = vmatprep.subr.bf16.mxu0 %v7500_v60  ;;  %v7555_v59 = vld [vmem:[%s8319_s14 + $0x4b0] sm:$0xff]   ;;  %v7556_v60 = vld [vmem:[%s8319_s14 + $0x478] sm:$0xff]  }
  0xec   : > { %6706 = vmatprep.subr.bf16.mxu1 %v7501_v61  ;;  %4792 = vmatprep.mubr.bf16.mxu0 %v373_v27  ;;  %v7557_v61 = vld [vmem:[%s8319_s14 + $0x4f8] sm:$0xff]   ;;  %v7579_v27 = vld [vmem:[%s8319_s14 + $0x5a0] sm:$0xff]  }
  0xed   : > { %4832 = vmatprep.mubr.bf16.mxu1 %v375_v28  ;;  %v7580_v28 = vld [vmem:[%s8319_s14 + $0x568] sm:$0xff]  }
  0xee   : > { %6685 = vmatpush3.bf16.msra.mxu0 %v7502_v62  ;;  %v7558_v62 = vld [vmem:[%s8319_s14 + $0x438] sm:$0xff]  }
  0xef   : > { %6707 = vmatpush3.bf16.msra.mxu1 %v7503_v63  ;;  %6686 = vmatprep.subr.bf16.mxu0 %v7504_v0  ;;  %v7559_v63 = vld [vmem:[%s8319_s14 + $0x4b8] sm:$0xff]   ;;  %v313_v0 = vld [vmem:[%s8312_s15 + $0x88] sm:$0xff] }
  0xf0   : > { %6708 = vmatprep.subr.bf16.mxu1 %v7505_v1  ;;  %v315_v1 = vld [vmem:[%s8312_s15 + $0x98] sm:$0xff] }
  0xf2   : > { %6687 = vmatpush3.bf16.msra.mxu0 %v7506_v2  ;;  %v377_v2 = vpack.c.bf16 %v313_v0, %v313_v0  ;;  %v7608_v0 = vld [vmem:[%s8319_s14 + $0x660] sm:$0xff]  }
  0xf3   : > { %6709 = vmatpush3.bf16.msra.mxu1 %v7507_v3  ;;  %6688 = vmatprep.subr.bf16.mxu0 %v7508_v4  ;;  %v379_v3 = vpack.c.bf16 %v315_v1, %v315_v1  ;;  %v312_v4 = vld [vmem:[%s8312_s15 + $0x80] sm:$0xff] }
  0xf4   : > { %6710 = vmatprep.subr.bf16.mxu1 %v7509_v5  ;;  %v314_v5 = vld [vmem:[%s8312_s15 + $0x90] sm:$0xff]  ;;  %v7609_v1 = vld [vmem:[%s8319_s14 + $0x6e0] sm:$0xff]  }
  0xf6   : > { %6689 = vmatpush3.bf16.msra.mxu0 %v7510_v6  ;;  %v376_v6 = vpack.c.bf16 %v312_v4, %v312_v4  ;;  %v7612_v4 = vld [vmem:[%s8319_s14 + $0x668] sm:$0xff]  }
  0xf7   : > { %6711 = vmatpush3.bf16.msra.mxu1 %v7511_v7  ;;  %6690 = vmatprep.subr.bf16.mxu0 %v7512_v8  ;;  %v378_v7 = vpack.c.bf16 %v314_v5, %v314_v5  ;;  %v7560_v8 = vld [vmem:[%s8319_s14 + $0x540] sm:$0xff]   ;;  %v7613_v5 = vld [vmem:[%s8319_s14 + $0x6e8] sm:$0xff]  }
  0xf8   : > { %6712 = vmatprep.subr.bf16.mxu1 %v7513_v9  ;;  %v7561_v9 = vld [vmem:[%s8319_s14 + $0x5c0] sm:$0xff]  }
  0xfa   : > { %6691 = vmatpush3.bf16.msra.mxu0 %v7514_v10  ;;  %v7562_v10 = vld [vmem:[%s8319_s14 + $0x500] sm:$0xff]  }
  0xfb   : > { %6713 = vmatpush3.bf16.msra.mxu1 %v7515_v11  ;;  %6692 = vmatprep.subr.bf16.mxu0 %v7516_v12  ;;  %v7563_v11 = vld [vmem:[%s8319_s14 + $0x580] sm:$0xff]   ;;  %v7564_v12 = vld [vmem:[%s8319_s14 + $0x548] sm:$0xff]  }
  0xfc   : > { %6714 = vmatprep.subr.bf16.mxu1 %v7517_v13  ;;  %v7565_v13 = vld [vmem:[%s8319_s14 + $0x5c8] sm:$0xff]  }
  0xfe   : > { %6693 = vmatpush3.bf16.msra.mxu0 %v7518_v14  ;;  %v7566_v14 = vld [vmem:[%s8319_s14 + $0x508] sm:$0xff]  }
  0xff   : > { %6715 = vmatpush3.bf16.msra.mxu1 %v7519_v15  ;;  %6694 = vmatprep.subr.bf16.mxu0 %v7520_v16  ;;  %v7567_v15 = vld [vmem:[%s8319_s14 + $0x588] sm:$0xff]   ;;  %v7568_v16 = vld [vmem:[%s8319_s14 + $0x550] sm:$0xff]  }
 0x100   : > { %6716 = vmatprep.subr.bf16.mxu1 %v7521_v17  ;;  %v7569_v17 = vld [vmem:[%s8319_s14 + $0x5d0] sm:$0xff]  }
 0x102   : > { %6695 = vmatpush3.bf16.msra.mxu0 %v7522_v18  ;;  %v7570_v18 = vld [vmem:[%s8319_s14 + $0x510] sm:$0xff]  }
 0x103   : > { %6717 = vmatpush3.bf16.msra.mxu1 %v7523_v19  ;;  %6696 = vmatprep.subr.bf16.mxu0 %v7524_v20  ;;  %v7571_v19 = vld [vmem:[%s8319_s14 + $0x590] sm:$0xff]   ;;  %v7572_v20 = vld [vmem:[%s8319_s14 + $0x558] sm:$0xff]  }
 0x104   : > { %6718 = vmatprep.subr.bf16.mxu1 %v7525_v21  ;;  %v7573_v21 = vld [vmem:[%s8319_s14 + $0x5d8] sm:$0xff]  }
 0x106   : > { %6697 = vmatpush3.bf16.msra.mxu0 %v7526_v22  ;;  %v7574_v22 = vld [vmem:[%s8319_s14 + $0x518] sm:$0xff]  }
 0x107   : > { %6719 = vmatpush3.bf16.msra.mxu1 %v7527_v23  ;;  %6726 = vmatprep.subr.bf16.mxu0 %v7528_v32  ;;  %v7575_v23 = vld [vmem:[%s8319_s14 + $0x598] sm:$0xff]   ;;  %v7584_v32 = vld [vmem:[%s8319_s14 + $0x570] sm:$0xff]  }
 0x108   : > { %6748 = vmatprep.subr.bf16.mxu1 %v7529_v33  ;;  %v7585_v33 = vld [vmem:[%s8319_s14 + $0x5f0] sm:$0xff]  }
 0x109   : > { %4793 = vmatmul.mubr.bf16.vlgmr.msra.gmra.mrb[12].mxu0 %v372_v29  ;;  %v7581_v29 = vld [vmem:[%s8319_s14 + $0x5e8] sm:$0xff]  }
 0x10a   : > { %4833 = vmatmul.mubr.bf16.vlgmr.msra.gmra.mrb[12].mxu1 %v374_v31  ;;  %6727 = vmatpush3.bf16.msra.mxu0 %v7530_v34  ;;  %v7583_v31 = vld [vmem:[%s8319_s14 + $0x5a8] sm:$0xff]   ;;  %v7586_v34 = vld [vmem:[%s8319_s14 + $0x530] sm:$0xff]  }
 0x10b   : > { %6749 = vmatpush3.bf16.msra.mxu1 %v7531_v35  ;;  %6728 = vmatprep.subr.bf16.mxu0 %v7532_v36  ;;  %v7587_v35 = vld [vmem:[%s8319_s14 + $0x5b0] sm:$0xff]   ;;  %v7588_v36 = vld [vmem:[%s8319_s14 + $0x578] sm:$0xff]  }
 0x10c   : > { %6750 = vmatprep.subr.bf16.mxu1 %v7533_v37  ;;  %4872 = vmatprep.mubr.bf16.mxu0 %v377_v2  ;;  %v7589_v37 = vld [vmem:[%s8319_s14 + $0x5f8] sm:$0xff]   ;;  %v7610_v2 = vld [vmem:[%s8319_s14 + $0x620] sm:$0xff]  }
 0x10d   : > { %4912 = vmatprep.mubr.bf16.mxu1 %v379_v3  ;;  %v7611_v3 = vld [vmem:[%s8319_s14 + $0x6a0] sm:$0xff]  }
 0x10e   : > { %6729 = vmatpush3.bf16.msra.mxu0 %v7534_v38  ;;  %v7590_v38 = vld [vmem:[%s8319_s14 + $0x538] sm:$0xff]  }
 0x10f   : > { %6751 = vmatpush3.bf16.msra.mxu1 %v7535_v39  ;;  %6730 = vmatprep.subr.bf16.mxu0 %v7536_v40  ;;  %v7591_v39 = vld [vmem:[%s8319_s14 + $0x5b8] sm:$0xff]   ;;  %v317_v40 = vld [vmem:[%s8312_s15 + $0xa8] sm:$0xff] }
 0x110   : > { %6752 = vmatprep.subr.bf16.mxu1 %v7537_v41  ;;  %v381_v41 = vpack.c.bf16 %v317_v40, %v317_v40 }
 0x112   : > { %6731 = vmatpush3.bf16.msra.mxu0 %v7538_v42  ;;  %v319_v42 = vld [vmem:[%s8312_s15 + $0xb8] sm:$0xff] }
 0x113   : > { %6753 = vmatpush3.bf16.msra.mxu1 %v7539_v43  ;;  %6732 = vmatprep.subr.bf16.mxu0 %v7540_v44  ;;  %v316_v43 = vld [vmem:[%s8312_s15 + $0xa0] sm:$0xff]  ;;  %v318_v44 = vld [vmem:[%s8312_s15 + $0xb0] sm:$0xff] }
 0x114   : > { %6754 = vmatprep.subr.bf16.mxu1 %v7541_v45  ;;  %v383_v45 = vpack.c.bf16 %v319_v42, %v319_v42 }
 0x116   : > { %6733 = vmatpush3.bf16.msra.mxu0 %v7542_v46  ;;  %v380_v46 = vpack.c.bf16 %v316_v43, %v316_v43  ;;  %v7640_v43 = vld [vmem:[%s8319_s14 + $0x760] sm:$0xff]  }
 0x117   : > { %6755 = vmatpush3.bf16.msra.mxu1 %v7543_v47  ;;  %6734 = vmatprep.subr.bf16.mxu0 %v7544_v48  ;;  %v382_v47 = vpack.c.bf16 %v318_v44, %v318_v44  ;;  %v7592_v48 = vld [vmem:[%s8319_s14 + $0x640] sm:$0xff]  }
 0x118   : > { %6756 = vmatprep.subr.bf16.mxu1 %v7545_v49  ;;  %v7593_v49 = vld [vmem:[%s8319_s14 + $0x6c0] sm:$0xff]  }
 0x11a   : > { %6735 = vmatpush3.bf16.msra.mxu0 %v7546_v50  ;;  %v7594_v50 = vld [vmem:[%s8319_s14 + $0x600] sm:$0xff]  }
 0x11b   : > { %6757 = vmatpush3.bf16.msra.mxu1 %v7547_v51  ;;  %6736 = vmatprep.subr.bf16.mxu0 %v7548_v52  ;;  %v7595_v51 = vld [vmem:[%s8319_s14 + $0x680] sm:$0xff]   ;;  %v7596_v52 = vld [vmem:[%s8319_s14 + $0x648] sm:$0xff]  }
 0x11c   : > { %6758 = vmatprep.subr.bf16.mxu1 %v7549_v53  ;;  %v7597_v53 = vld [vmem:[%s8319_s14 + $0x6c8] sm:$0xff]  }
 0x11e   : > { %6737 = vmatpush3.bf16.msra.mxu0 %v7550_v54  ;;  %v7598_v54 = vld [vmem:[%s8319_s14 + $0x608] sm:$0xff]  }
 0x11f   : > { %6759 = vmatpush3.bf16.msra.mxu1 %v7551_v55  ;;  %6738 = vmatprep.subr.bf16.mxu0 %v7552_v56  ;;  %v7599_v55 = vld [vmem:[%s8319_s14 + $0x688] sm:$0xff]   ;;  %v7600_v56 = vld [vmem:[%s8319_s14 + $0x650] sm:$0xff]  }
 0x120   : > { %6760 = vmatprep.subr.bf16.mxu1 %v7553_v57  ;;  %v7601_v57 = vld [vmem:[%s8319_s14 + $0x6d0] sm:$0xff]  }
 0x122   : > { %6739 = vmatpush3.bf16.msra.mxu0 %v7554_v58  ;;  %v7602_v58 = vld [vmem:[%s8319_s14 + $0x610] sm:$0xff]  }
 0x123   : > { %6761 = vmatpush3.bf16.msra.mxu1 %v7555_v59  ;;  %6740 = vmatprep.subr.bf16.mxu0 %v7556_v60  ;;  %v7603_v59 = vld [vmem:[%s8319_s14 + $0x690] sm:$0xff]   ;;  %v7604_v60 = vld [vmem:[%s8319_s14 + $0x658] sm:$0xff]  }
 0x124   : > { %6762 = vmatprep.subr.bf16.mxu1 %v7557_v61  ;;  %v7605_v61 = vld [vmem:[%s8319_s14 + $0x6d8] sm:$0xff]  }
 0x126   : > { %6741 = vmatpush3.bf16.msra.mxu0 %v7558_v62  ;;  %v7606_v62 = vld [vmem:[%s8319_s14 + $0x618] sm:$0xff]  }
 0x127   : > { %6763 = vmatpush3.bf16.msra.mxu1 %v7559_v63  ;;  %6770 = vmatprep.subr.bf16.mxu0 %v7560_v8  ;;  %v7607_v63 = vld [vmem:[%s8319_s14 + $0x698] sm:$0xff]   ;;  %v7616_v8 = vld [vmem:[%s8319_s14 + $0x670] sm:$0xff]  }
 0x128   : > { %6792 = vmatprep.subr.bf16.mxu1 %v7561_v9  ;;  %v7617_v9 = vld [vmem:[%s8319_s14 + $0x6f0] sm:$0xff]  }
 0x129   : > { %4873 = vmatmul.mubr.bf16.vlgmr.msra.gmra.mrb[16].mxu0 %v376_v6  ;;  %v7614_v6 = vld [vmem:[%s8319_s14 + $0x628] sm:$0xff]  }
 0x12a   : > { %4913 = vmatmul.mubr.bf16.vlgmr.msra.gmra.mrb[16].mxu1 %v378_v7  ;;  %6771 = vmatpush3.bf16.msra.mxu0 %v7562_v10  ;;  %v7615_v7 = vld [vmem:[%s8319_s14 + $0x6a8] sm:$0xff]   ;;  %v7618_v10 = vld [vmem:[%s8319_s14 + $0x630] sm:$0xff]  }
 0x12b   : > { %6793 = vmatpush3.bf16.msra.mxu1 %v7563_v11  ;;  %6772 = vmatprep.subr.bf16.mxu0 %v7564_v12  ;;  %v7619_v11 = vld [vmem:[%s8319_s14 + $0x6b0] sm:$0xff]   ;;  %v7620_v12 = vld [vmem:[%s8319_s14 + $0x678] sm:$0xff]  }
 0x12c   : > { %6794 = vmatprep.subr.bf16.mxu1 %v7565_v13  ;;  %4952 = vmatprep.mubr.bf16.mxu0 %v381_v41  ;;  %v7621_v13 = vld [vmem:[%s8319_s14 + $0x6f8] sm:$0xff]  }
 0x12d   : > { %4992 = vmatprep.mubr.bf16.mxu1 %v383_v45  ;;  %v7639_v41 = vld [vmem:[%s8319_s14 + $0x798] sm:$0xff]  }
 0x12e   : > { %6773 = vmatpush3.bf16.msra.mxu0 %v7566_v14  ;;  %v7622_v14 = vld [vmem:[%s8319_s14 + $0x638] sm:$0xff]  }
 0x12f   : > { %6795 = vmatpush3.bf16.msra.mxu1 %v7567_v15  ;;  %6774 = vmatprep.subr.bf16.mxu0 %v7568_v16  ;;  %v7623_v15 = vld [vmem:[%s8319_s14 + $0x6b8] sm:$0xff]   ;;  %v321_v16 = vld [vmem:[%s8312_s15 + $0xc8] sm:$0xff] }
 0x130   : > { %6796 = vmatprep.subr.bf16.mxu1 %v7569_v17  ;;  %v323_v17 = vld [vmem:[%s8312_s15 + $0xd8] sm:$0xff] }
 0x132   : > { %6775 = vmatpush3.bf16.msra.mxu0 %v7570_v18  ;;  %v320_v18 = vld [vmem:[%s8312_s15 + $0xc0] sm:$0xff] }
 0x133   : > { %6797 = vmatpush3.bf16.msra.mxu1 %v7571_v19  ;;  %6776 = vmatprep.subr.bf16.mxu0 %v7572_v20  ;;  %v385_v19 = vpack.c.bf16 %v321_v16, %v321_v16  ;;  %v387_v20 = vpack.c.bf16 %v323_v17, %v323_v17  ;;  %v7661_v16 = vld [vmem:[%s8319_s14 + $0x8c8] sm:$0xff]  }
 0x134   : > { %6798 = vmatprep.subr.bf16.mxu1 %v7573_v21  ;;  %v384_v21 = vpack.c.bf16 %v320_v18, %v320_v18  ;;  %v7662_v17 = vld [vmem:[%s8319_s14 + $0x808] sm:$0xff]  }
 0x135   : > { %v7663_v18 = vld [vmem:[%s8319_s14 + $0x888] sm:$0xff]  }
 0x136   : > { %6777 = vmatpush3.bf16.msra.mxu0 %v7574_v22  ;;  %v322_v22 = vld [vmem:[%s8312_s15 + $0xd0] sm:$0xff] }
 0x137   : > { %6799 = vmatpush3.bf16.msra.mxu1 %v7575_v23  ;;  %6778 = vmatprep.subr.bf16.mxu0 %v7576_v24  ;;  %v386_v23 = vpack.c.bf16 %v322_v22, %v322_v22  ;;  %v7624_v24 = vld [vmem:[%s8319_s14 + $0x740] sm:$0xff]   ;;  %v7667_v22 = vld [vmem:[%s8319_s14 + $0x890] sm:$0xff]  }
 0x138   : > { %6800 = vmatprep.subr.bf16.mxu1 %v7577_v25  ;;  %v7625_v25 = vld [vmem:[%s8319_s14 + $0x7c0] sm:$0xff]  }
 0x13a   : > { %6779 = vmatpush3.bf16.msra.mxu0 %v7578_v26  ;;  %v7626_v26 = vld [vmem:[%s8319_s14 + $0x700] sm:$0xff]  }
 0x13b   : > { %6801 = vmatpush3.bf16.msra.mxu1 %v7579_v27  ;;  %6780 = vmatprep.subr.bf16.mxu0 %v7580_v28  ;;  %v7627_v27 = vld [vmem:[%s8319_s14 + $0x780] sm:$0xff]   ;;  %v7628_v28 = vld [vmem:[%s8319_s14 + $0x748] sm:$0xff]  }
 0x13c   : > { %6802 = vmatprep.subr.bf16.mxu1 %v7581_v29  ;;  %v7629_v29 = vld [vmem:[%s8319_s14 + $0x7c8] sm:$0xff]  }
 0x13e   : > { %6781 = vmatpush3.bf16.msra.mxu0 %v7582_v30  ;;  %v7630_v30 = vld [vmem:[%s8319_s14 + $0x708] sm:$0xff]  }
 0x13f   : > { %6803 = vmatpush3.bf16.msra.mxu1 %v7583_v31  ;;  %6782 = vmatprep.subr.bf16.mxu0 %v7584_v32  ;;  %v7631_v31 = vld [vmem:[%s8319_s14 + $0x788] sm:$0xff]   ;;  %v7632_v32 = vld [vmem:[%s8319_s14 + $0x750] sm:$0xff]  }
 0x140   : > { %6804 = vmatprep.subr.bf16.mxu1 %v7585_v33  ;;  %v7633_v33 = vld [vmem:[%s8319_s14 + $0x7d0] sm:$0xff]  }
 0x142   : > { %6783 = vmatpush3.bf16.msra.mxu0 %v7586_v34  ;;  %v7634_v34 = vld [vmem:[%s8319_s14 + $0x710] sm:$0xff]  }
 0x143   : > { %6805 = vmatpush3.bf16.msra.mxu1 %v7587_v35  ;;  %6784 = vmatprep.subr.bf16.mxu0 %v7588_v36  ;;  %v7635_v35 = vld [vmem:[%s8319_s14 + $0x790] sm:$0xff]   ;;  %v7636_v36 = vld [vmem:[%s8319_s14 + $0x758] sm:$0xff]  }
 0x144   : > { %6806 = vmatprep.subr.bf16.mxu1 %v7589_v37  ;;  %v7637_v37 = vld [vmem:[%s8319_s14 + $0x7d8] sm:$0xff]  }
 0x146   : > { %6785 = vmatpush3.bf16.msra.mxu0 %v7590_v38 }
 0x147   : > { %6807 = vmatpush3.bf16.msra.mxu1 %v7591_v39  ;;  %6814 = vmatprep.subr.bf16.mxu0 %v7592_v48  ;;  %v7638_v39 = vld [vmem:[%s8319_s14 + $0x718] sm:$0xff]  }
 0x148   : > { %6836 = vmatprep.subr.bf16.mxu1 %v7593_v49  ;;  %v7642_v49 = vld [vmem:[%s8319_s14 + $0x720] sm:$0xff]  }
 0x149   : > { %4953 = vmatmul.mubr.bf16.vlgmr.msra.gmra.mrb[20].mxu0 %v380_v46  ;;  %v7641_v46 = vld [vmem:[%s8319_s14 + $0x7e0] sm:$0xff]  }
 0x14a   : > { %4993 = vmatmul.mubr.bf16.vlgmr.msra.gmra.mrb[20].mxu1 %v382_v47  ;;  %6815 = vmatpush3.bf16.msra.mxu0 %v7594_v50 }
 0x14b   : > { %6837 = vmatpush3.bf16.msra.mxu1 %v7595_v51  ;;  %6816 = vmatprep.subr.bf16.mxu0 %v7596_v52  ;;  %v7643_v51 = vld [vmem:[%s8319_s14 + $0x7a0] sm:$0xff]  }
 0x14c   : > { %6838 = vmatprep.subr.bf16.mxu1 %v7597_v53  ;;  %5032 = vmatprep.mubr.bf16.mxu0 %v385_v19  ;;  %v7664_v19 = vld [vmem:[%s8319_s14 + $0x850] sm:$0xff]  }
 0x14d   : > { %5072 = vmatprep.mubr.bf16.mxu1 %v387_v20  ;;  %v7665_v20 = vld [vmem:[%s8319_s14 + $0x8d0] sm:$0xff]  }
 0x14e   : > { %6817 = vmatpush3.bf16.msra.mxu0 %v7598_v54  ;;  %v7644_v54 = vld [vmem:[%s8319_s14 + $0x768] sm:$0xff]  }
 0x14f   : > { %6839 = vmatpush3.bf16.msra.mxu1 %v7599_v55  ;;  %6818 = vmatprep.subr.bf16.mxu0 %v7600_v56  ;;  %v7645_v56 = vld [vmem:[%s8319_s14 + $0x7e8] sm:$0xff]  }
 0x150   : > { %6840 = vmatprep.subr.bf16.mxu1 %v7601_v57  ;;  %v7646_v57 = vld [vmem:[%s8319_s14 + $0x728] sm:$0xff]  }
 0x152   : > { %6819 = vmatpush3.bf16.msra.mxu0 %v7602_v58  ;;  %v7647_v58 = vld [vmem:[%s8319_s14 + $0x7a8] sm:$0xff]  }
 0x153   : > { %6841 = vmatpush3.bf16.msra.mxu1 %v7603_v59  ;;  %6820 = vmatprep.subr.bf16.mxu0 %v7604_v60  ;;  %v7648_v59 = vld [vmem:[%s8319_s14 + $0x770] sm:$0xff]  }
 0x154   : > { %6842 = vmatprep.subr.bf16.mxu1 %v7605_v61  ;;  %v7649_v60 = vld [vmem:[%s8319_s14 + $0x7f0] sm:$0xff]  }
 0x155   : > { %v7650_v61 = vld [vmem:[%s8319_s14 + $0x730] sm:$0xff]  }
 0x156   : > { %6821 = vmatpush3.bf16.msra.mxu0 %v7606_v62  ;;  %v7651_v62 = vld [vmem:[%s8319_s14 + $0x7b0] sm:$0xff]  }
 0x157   : > { %6843 = vmatpush3.bf16.msra.mxu1 %v7607_v63  ;;  %6822 = vmatprep.subr.bf16.mxu0 %v7608_v0  ;;  %v7652_v63 = vld [vmem:[%s8319_s14 + $0x778] sm:$0xff]  }
 0x158   : > { %6844 = vmatprep.subr.bf16.mxu1 %v7609_v1  ;;  %v7653_v0 = vld [vmem:[%s8319_s14 + $0x7f8] sm:$0xff]  }
 0x159   : > { %v7654_v1 = vld [vmem:[%s8319_s14 + $0x738] sm:$0xff]  }
 0x15a   : > { %6823 = vmatpush3.bf16.msra.mxu0 %v7610_v2  ;;  %v7655_v2 = vld [vmem:[%s8319_s14 + $0x7b8] sm:$0xff]  }
 0x15b   : > { %6845 = vmatpush3.bf16.msra.mxu1 %v7611_v3  ;;  %6824 = vmatprep.subr.bf16.mxu0 %v7612_v4  ;;  %v325_v3 = vld [vmem:[%s8312_s15 + $0xe8] sm:$0xff]  ;;  %v327_v4 = vld [vmem:[%s8312_s15 + $0xf8] sm:$0xff] }
 0x15c   : > { %6846 = vmatprep.subr.bf16.mxu1 %v7613_v5  ;;  %v389_v5 = vpack.c.bf16 %v325_v3, %v325_v3  ;;  %v7692_v3 = vld [vmem:[%s8319_s14 + $0x948] sm:$0xff]  }
 0x15e   : > { %6825 = vmatpush3.bf16.msra.mxu0 %v7614_v6  ;;  %v391_v6 = vpack.c.bf16 %v327_v4, %v327_v4  ;;  %v7693_v4 = vld [vmem:[%s8319_s14 + $0x9c8] sm:$0xff]  }
 0x15f   : > { %6847 = vmatpush3.bf16.msra.mxu1 %v7615_v7  ;;  %6826 = vmatprep.subr.bf16.mxu0 %v7616_v8  ;;  %v324_v7 = vld [vmem:[%s8312_s15 + $0xe0] sm:$0xff]  ;;  %v326_v8 = vld [vmem:[%s8312_s15 + $0xf0] sm:$0xff] }
 0x160   : > { %6848 = vmatprep.subr.bf16.mxu1 %v7617_v9  ;;  %v388_v9 = vpack.c.bf16 %v324_v7, %v324_v7  ;;  %v7696_v7 = vld [vmem:[%s8319_s14 + $0x950] sm:$0xff]  }
 0x162   : > { %6827 = vmatpush3.bf16.msra.mxu0 %v7618_v10  ;;  %v390_v10 = vpack.c.bf16 %v326_v8, %v326_v8  ;;  %v7697_v8 = vld [vmem:[%s8319_s14 + $0x9d0] sm:$0xff]  }
 0x163   : > { %6849 = vmatpush3.bf16.msra.mxu1 %v7619_v11  ;;  %6828 = vmatprep.subr.bf16.mxu0 %v7620_v12  ;;  %v7656_v11 = vld [vmem:[%s8319_s14 + $0x840] sm:$0xff]  }
 0x164   : > { %6850 = vmatprep.subr.bf16.mxu1 %v7621_v13  ;;  %v7657_v12 = vld [vmem:[%s8319_s14 + $0x8c0] sm:$0xff]  }
 0x165   : > { %v7658_v13 = vld [vmem:[%s8319_s14 + $0x800] sm:$0xff]  }
 0x166   : > { %6829 = vmatpush3.bf16.msra.mxu0 %v7622_v14  ;;  %v7659_v14 = vld [vmem:[%s8319_s14 + $0x880] sm:$0xff]  }
 0x167   : > { %6851 = vmatpush3.bf16.msra.mxu1 %v7623_v15  ;;  %6858 = vmatprep.subr.bf16.mxu0 %v7624_v24  ;;  %v7660_v15 = vld [vmem:[%s8319_s14 + $0x848] sm:$0xff]   ;;  %v7669_v24 = vld [vmem:[%s8319_s14 + $0x8d8] sm:$0xff]  }
 0x168   : > { %6880 = vmatprep.subr.bf16.mxu1 %v7625_v25 }
 0x169   : > { %5033 = vmatmul.mubr.bf16.vlgmr.msra.gmra.mrb[24].mxu0 %v384_v21  ;;  %v7666_v21 = vld [vmem:[%s8319_s14 + $0x810] sm:$0xff]  }
 0x16a   : > { %5073 = vmatmul.mubr.bf16.vlgmr.msra.gmra.mrb[24].mxu1 %v386_v23  ;;  %6859 = vmatpush3.bf16.msra.mxu0 %v7626_v26  ;;  %v7668_v23 = vld [vmem:[%s8319_s14 + $0x858] sm:$0xff]  }
 0x16b   : > { %6881 = vmatpush3.bf16.msra.mxu1 %v7627_v27  ;;  %6860 = vmatprep.subr.bf16.mxu0 %v7628_v28  ;;  %v7670_v26 = vld [vmem:[%s8319_s14 + $0x818] sm:$0xff]  }
 0x16c   : > { %6882 = vmatprep.subr.bf16.mxu1 %v7629_v29  ;;  %5112 = vmatprep.mubr.bf16.mxu0 %v389_v5  ;;  %v7671_v28 = vld [vmem:[%s8319_s14 + $0x898] sm:$0xff]   ;;  %v7694_v5 = vld [vmem:[%s8319_s14 + $0x908] sm:$0xff]  }
 0x16d   : > { %5152 = vmatprep.mubr.bf16.mxu1 %v391_v6  ;;  %v7695_v6 = vld [vmem:[%s8319_s14 + $0x988] sm:$0xff]  }
 0x16e   : > { %6861 = vmatpush3.bf16.msra.mxu0 %v7630_v30  ;;  %v7672_v30 = vld [vmem:[%s8319_s14 + $0x860] sm:$0xff]  }
 0x16f   : > { %6883 = vmatpush3.bf16.msra.mxu1 %v7631_v31  ;;  %6862 = vmatprep.subr.bf16.mxu0 %v7632_v32 }
 0x170   : > { %6884 = vmatprep.subr.bf16.mxu1 %v7633_v33  ;;  %v7673_v33 = vld [vmem:[%s8319_s14 + $0x8e0] sm:$0xff]  }
 0x172   : > { %6863 = vmatpush3.bf16.msra.mxu0 %v7634_v34 }
 0x173   : > { %6885 = vmatpush3.bf16.msra.mxu1 %v7635_v35  ;;  %6864 = vmatprep.subr.bf16.mxu0 %v7636_v36  ;;  %v7674_v36 = vld [vmem:[%s8319_s14 + $0x820] sm:$0xff]  }
 0x174   : > { %6886 = vmatprep.subr.bf16.mxu1 %v7637_v37 }
 0x176   : > { %6865 = vmatpush3.bf16.msra.mxu0 %v7638_v39  ;;  %v7675_v39 = vld [vmem:[%s8319_s14 + $0x8a0] sm:$0xff]  }
 0x177   : > { %6887 = vmatpush3.bf16.msra.mxu1 %v7639_v41  ;;  %6866 = vmatprep.subr.bf16.mxu0 %v7640_v43 }
 0x178   : > { %6888 = vmatprep.subr.bf16.mxu1 %v7641_v46  ;;  %v7679_v46 = vld [vmem:[%s8319_s14 + $0x8a8] sm:$0xff]  }
 0x17a   : > { %6867 = vmatpush3.bf16.msra.mxu0 %v7642_v49  ;;  %v7682_v49 = vld [vmem:[%s8319_s14 + $0x830] sm:$0xff]  }
 0x17b   : > { %6889 = vmatpush3.bf16.msra.mxu1 %v7643_v51  ;;  %6868 = vmatprep.subr.bf16.mxu0 %v7644_v54  ;;  %v7684_v51 = vld [vmem:[%s8319_s14 + $0x878] sm:$0xff]  }
 0x17c   : > { %v6566_v38 = vpop.f32.mrb[0].mxu0  ;;  %6890 = vmatprep.subr.bf16.mxu1 %v7645_v56  ;;  %v7687_v54 = vld [vmem:[%s8319_s14 + $0x8b8] sm:$0xff]  }
 0x17d   : > { %v6588_v40 = vpop.f32.mrb[0].mxu1  ;;  %v6567_v42 = vpop.f32.mrb[1].mxu0 }
 0x17e   : > { %v6568_v44 = vadd.f32 %v6567_v42, %v6566_v38  ;;  %v6589_v45 = vpop.f32.mrb[1].mxu1  ;;  %v6569_v48 = vpop.f32.mrb[2].mxu0  ;;  %6869 = vmatpush3.bf16.msra.mxu0 %v7646_v57  ;;  %v7676_v42 = vld [vmem:[%s8319_s14 + $0x868] sm:$0xff]   ;;  %v331_v57 = vld [vmem:[%s8312_s15 + $0x118] sm:$0xff] }
 0x17f   : > { %v6590_v47 = vadd.f32 %v6589_v45, %v6588_v40  ;;  %v6591_v50 = vpop.f32.mrb[2].mxu1  ;;  %v6570_v53 = vpop.f32.mrb[3].mxu0  ;;  %6891 = vmatpush3.bf16.msra.mxu1 %v7647_v58  ;;  %6870 = vmatprep.subr.bf16.mxu0 %v7648_v59  ;;  %v7678_v45 = vld [vmem:[%s8319_s14 + $0x828] sm:$0xff]   ;;  %v7681_v48 = vld [vmem:[%s8319_s14 + $0x8f0] sm:$0xff]   ;;  %v328_v58 = vld [vmem:[%s8312_s15 + $0x100] sm:$0xff] }
 0x180   : > { %v6592_v55 = vpop.f32.mrb[3].mxu1  ;;  %6892 = vmatprep.subr.bf16.mxu1 %v7649_v60  ;;  %v7683_v50 = vld [vmem:[%s8319_s14 + $0x8b0] sm:$0xff]   ;;  %v7686_v53 = vld [vmem:[%s8319_s14 + $0x838] sm:$0xff]   ;;  %v395_v60 = vpack.c.bf16 %v331_v57, %v331_v57  ;;  %v7726_v57 = vld [vmem:[%s8319_s14 + $0xa08] sm:$0xff]  }
 0x181   : > { %v8605_v52 = vadd.f32 %v6590_v47, %v6568_v44  ;;  %v7677_v44 = vld [vmem:[%s8319_s14 + $0x8e8] sm:$0xff]   ;;  %v7680_v47 = vld [vmem:[%s8319_s14 + $0x870] sm:$0xff]  }
 0x182   : > { %6871 = vmatpush3.bf16.msra.mxu0 %v7650_v61  ;;  %v329_v55 = vld [vmem:[%s8312_s15 + $0x108] sm:$0xff]  ;;  %v330_v59 = vld [vmem:[%s8312_s15 + $0x110] sm:$0xff]  ;;  %v392_v61 = vpack.c.bf16 %v328_v58, %v328_v58 }
 0x183   : > { %6893 = vmatpush3.bf16.msra.mxu1 %v7651_v62  ;;  %6872 = vmatprep.subr.bf16.mxu0 %v7652_v63  ;;  %v393_v56 = vpack.c.bf16 %v329_v55, %v329_v55  ;;  %v394_v62 = vpack.c.bf16 %v330_v59, %v330_v59  ;;  %v7688_v63 = vld [vmem:[%s8319_s14 + $0x940] sm:$0xff]   ;;  %v7724_v55 = vld [vmem:[%s8319_s14 + $0xa48] sm:$0xff]   ;;  %v7728_v59 = vld [vmem:[%s8319_s14 + $0xa50] sm:$0xff]  }
 0x184   : > { %6894 = vmatprep.subr.bf16.mxu1 %v7653_v0  ;;  %v7689_v0 = vld [vmem:[%s8319_s14 + $0x9c0] sm:$0xff]   ;;  %v7727_v58 = vld [vmem:[%s8319_s14 + $0xa88] sm:$0xff]  }
 0x186   : > { %6873 = vmatpush3.bf16.msra.mxu0 %v7654_v1  ;;  %v7690_v1 = vld [vmem:[%s8319_s14 + $0x900] sm:$0xff]  }
 0x187   : > { %6895 = vmatpush3.bf16.msra.mxu1 %v7655_v2  ;;  %6902 = vmatprep.subr.bf16.mxu0 %v7656_v11  ;;  %v7691_v2 = vld [vmem:[%s8319_s14 + $0x980] sm:$0xff]   ;;  %v7700_v11 = vld [vmem:[%s8319_s14 + $0x958] sm:$0xff]  }
 0x188   : > { %6924 = vmatprep.subr.bf16.mxu1 %v7657_v12  ;;  %v7701_v12 = vld [vmem:[%s8319_s14 + $0x9d8] sm:$0xff]  }
 0x189   : > { %5113 = vmatmul.mubr.bf16.vlgmr.msra.gmra.mrb[28].mxu0 %v388_v9  ;;  %v7698_v9 = vld [vmem:[%s8319_s14 + $0x910] sm:$0xff]  }
 0x18a   : > { %5153 = vmatmul.mubr.bf16.vlgmr.msra.gmra.mrb[28].mxu1 %v390_v10  ;;  %6903 = vmatpush3.bf16.msra.mxu0 %v7658_v13  ;;  %v7699_v10 = vld [vmem:[%s8319_s14 + $0x990] sm:$0xff]  }
 0x18b   : > { %6925 = vmatpush3.bf16.msra.mxu1 %v7659_v14  ;;  %6904 = vmatprep.subr.bf16.mxu0 %v7660_v15  ;;  %v7702_v14 = vld [vmem:[%s8319_s14 + $0x918] sm:$0xff]  }
 0x18c   : > { %6926 = vmatprep.subr.bf16.mxu1 %v7661_v16  ;;  %5192 = vmatprep.mubr.bf16.mxu0 %v393_v56  ;;  %v7703_v16 = vld [vmem:[%s8319_s14 + $0x998] sm:$0xff]   ;;  %v7725_v56 = vld [vmem:[%s8319_s14 + $0xac8] sm:$0xff]  }
 0x18d   : > { %5232 = vmatprep.mubr.bf16.mxu1 %v395_v60  ;;  %v7729_v60 = vld [vmem:[%s8319_s14 + $0xad0] sm:$0xff]  }
 0x18e   : > { %6905 = vmatpush3.bf16.msra.mxu0 %v7662_v17 }
 0x18f   : > { %6927 = vmatpush3.bf16.msra.mxu1 %v7663_v18  ;;  %6906 = vmatprep.subr.bf16.mxu0 %v7664_v19  ;;  %v7704_v18 = vld [vmem:[%s8319_s14 + $0x960] sm:$0xff]  }
 0x190   : > { %6928 = vmatprep.subr.bf16.mxu1 %v7665_v20 }
 0x192   : > { %6907 = vmatpush3.bf16.msra.mxu0 %v7666_v21  ;;  %v7705_v21 = vld [vmem:[%s8319_s14 + $0x9e0] sm:$0xff]  }
 0x193   : > { %6929 = vmatpush3.bf16.msra.mxu1 %v7667_v22  ;;  %6908 = vmatprep.subr.bf16.mxu0 %v7668_v23 }
 0x194   : > { %6930 = vmatprep.subr.bf16.mxu1 %v7669_v24  ;;  %v7706_v24 = vld [vmem:[%s8319_s14 + $0x920] sm:$0xff]  }
 0x196   : > { %6909 = vmatpush3.bf16.msra.mxu0 %v7670_v26 }
 0x197   : > { %6931 = vmatpush3.bf16.msra.mxu1 %v7671_v28  ;;  %6910 = vmatprep.subr.bf16.mxu0 %v7672_v30  ;;  %v7708_v30 = vld [vmem:[%s8319_s14 + $0x968] sm:$0xff]  }
 0x198   : > { %6932 = vmatprep.subr.bf16.mxu1 %v7673_v33  ;;  %v7710_v33 = vld [vmem:[%s8319_s14 + $0x928] sm:$0xff]  }
 0x19a   : > { %6911 = vmatpush3.bf16.msra.mxu0 %v7674_v36  ;;  %v7713_v36 = vld [vmem:[%s8319_s14 + $0x9f0] sm:$0xff]  }
 0x19b   : > { %6933 = vmatpush3.bf16.msra.mxu1 %v7675_v39  ;;  %6912 = vmatprep.subr.bf16.mxu0 %v7676_v42  ;;  %v7716_v39 = vld [vmem:[%s8319_s14 + $0x978] sm:$0xff]  }
 0x19c   : > { %v6610_v25 = vpop.f32.mrb[4].mxu0  ;;  %6934 = vmatprep.subr.bf16.mxu1 %v7677_v44  ;;  %v7719_v42 = vld [vmem:[%s8319_s14 + $0x9b8] sm:$0xff]  }
 0x19d   : > { %v6632_v27 = vpop.f32.mrb[4].mxu1  ;;  %v6611_v29 = vpop.f32.mrb[5].mxu0  ;;  %v335_v44 = vld [vmem:[%s8312_s15 + $0x138] sm:$0xff] }
 0x19e   : > { %v6612_v31 = vadd.f32 %v6611_v29, %v6610_v25  ;;  %v6633_v32 = vpop.f32.mrb[5].mxu1  ;;  %v6613_v35 = vpop.f32.mrb[6].mxu0  ;;  %6913 = vmatpush3.bf16.msra.mxu0 %v7678_v45  ;;  %v332_v45 = vld [vmem:[%s8312_s15 + $0x120] sm:$0xff] }
 0x19f   : > { %v6634_v34 = vadd.f32 %v6633_v32, %v6632_v27  ;;  %v6635_v38 = vpop.f32.mrb[6].mxu1  ;;  %v6614_v40 = vpop.f32.mrb[7].mxu0  ;;  %6935 = vmatpush3.bf16.msra.mxu1 %v7679_v46  ;;  %6914 = vmatprep.subr.bf16.mxu0 %v7680_v47  ;;  %v7707_v27 = vld [vmem:[%s8319_s14 + $0x9a0] sm:$0xff]   ;;  %v7709_v32 = vld [vmem:[%s8319_s14 + $0x9e8] sm:$0xff]   ;;  %v7712_v35 = vld [vmem:[%s8319_s14 + $0x970] sm:$0xff]   ;;  %v399_v47 = vpack.c.bf16 %v335_v44, %v335_v44 }
 0x1a0   : > { %v4635_v37 = vadd.f32 %v6612_v31, %v8605_v52  ;;  %v6636_v43 = vpop.f32.mrb[7].mxu1  ;;  %6936 = vmatprep.subr.bf16.mxu1 %v7681_v48  ;;  %v7685_v52 = vld [vmem:[%s8319_s14 + $0x8f8] sm:$0xff]   ;;  %v7715_v38 = vld [vmem:[%s8319_s14 + $0x9b0] sm:$0xff]   ;;  %v396_v48 = vpack.c.bf16 %v332_v45, %v332_v45  ;;  %v7757_v44 = vld [vmem:[%s8319_s14 + $0xbc8] sm:$0xff]  }
 0x1a1   : > { %v7717_v40 = vld [vmem:[%s8319_s14 + $0x9f8] sm:$0xff]   ;;  %v333_v43 = vld [vmem:[%s8312_s15 + $0x128] sm:$0xff] }
 0x1a2   : > { %v8644_v41 = vadd.f32 %v6634_v34, %v4635_v37  ;;  %6915 = vmatpush3.bf16.msra.mxu0 %v7682_v49  ;;  %v7711_v34 = vld [vmem:[%s8319_s14 + $0x9a8] sm:$0xff]   ;;  %v7714_v37 = vld [vmem:[%s8319_s14 + $0x930] sm:$0xff]   ;;  %v397_v46 = vpack.c.bf16 %v333_v43, %v333_v43 }
 0x1a3   : > { %6937 = vmatpush3.bf16.msra.mxu1 %v7683_v50  ;;  %6916 = vmatprep.subr.bf16.mxu0 %v7684_v51  ;;  %v334_v49 = vld [vmem:[%s8312_s15 + $0x130] sm:$0xff]  ;;  %v7720_v51 = vld [vmem:[%s8319_s14 + $0xa40] sm:$0xff]   ;;  %v7756_v43 = vld [vmem:[%s8319_s14 + $0xb48] sm:$0xff]  }
 0x1a4   : > { %6938 = vmatprep.subr.bf16.mxu1 %v7685_v52  ;;  %v398_v50 = vpack.c.bf16 %v334_v49, %v334_v49  ;;  %v7721_v52 = vld [vmem:[%s8319_s14 + $0xac0] sm:$0xff]   ;;  %v7758_v45 = vld [vmem:[%s8319_s14 + $0xb08] sm:$0xff]   ;;  %v7762_v49 = vld [vmem:[%s8319_s14 + $0xb10] sm:$0xff]  }
 0x1a6   : > { %6917 = vmatpush3.bf16.msra.mxu0 %v7686_v53  ;;  %v7722_v53 = vld [vmem:[%s8319_s14 + $0xa00] sm:$0xff]  }
 0x1a7   : > { %6939 = vmatpush3.bf16.msra.mxu1 %v7687_v54  ;;  %6946 = vmatprep.subr.bf16.mxu0 %v7688_v63  ;;  %v7723_v54 = vld [vmem:[%s8319_s14 + $0xa80] sm:$0xff]   ;;  %v7732_v63 = vld [vmem:[%s8319_s14 + $0xa58] sm:$0xff]  }
 0x1a8   : > { %6968 = vmatprep.subr.bf16.mxu1 %v7689_v0  ;;  %v7733_v0 = vld [vmem:[%s8319_s14 + $0xad8] sm:$0xff]  }
 0x1a9   : > { %5193 = vmatmul.mubr.bf16.vlgmr.msra.gmra.mrb[32].mxu0 %v392_v61  ;;  %v7730_v61 = vld [vmem:[%s8319_s14 + $0xa10] sm:$0xff]  }
 0x1aa   : > { %5233 = vmatmul.mubr.bf16.vlgmr.msra.gmra.mrb[32].mxu1 %v394_v62  ;;  %6947 = vmatpush3.bf16.msra.mxu0 %v7690_v1  ;;  %v7731_v62 = vld [vmem:[%s8319_s14 + $0xa90] sm:$0xff]  }
 0x1ab   : > { %6969 = vmatpush3.bf16.msra.mxu1 %v7691_v2  ;;  %6948 = vmatprep.subr.bf16.mxu0 %v7692_v3  ;;  %v7734_v2 = vld [vmem:[%s8319_s14 + $0xa18] sm:$0xff]  }
 0x1ac   : > { %6970 = vmatprep.subr.bf16.mxu1 %v7693_v4  ;;  %5272 = vmatprep.mubr.bf16.mxu0 %v397_v46  ;;  %v7735_v4 = vld [vmem:[%s8319_s14 + $0xa98] sm:$0xff]   ;;  %v7759_v46 = vld [vmem:[%s8319_s14 + $0xb88] sm:$0xff]  }
 0x1ad   : > { %5312 = vmatprep.mubr.bf16.mxu1 %v399_v47  ;;  %v7760_v47 = vld [vmem:[%s8319_s14 + $0xb50] sm:$0xff]  }
 0x1ae   : > { %6949 = vmatpush3.bf16.msra.mxu0 %v7694_v5 }
 0x1af   : > { %6971 = vmatpush3.bf16.msra.mxu1 %v7695_v6  ;;  %6950 = vmatprep.subr.bf16.mxu0 %v7696_v7  ;;  %v7736_v6 = vld [vmem:[%s8319_s14 + $0xa60] sm:$0xff]  }
 0x1b0   : > { %6972 = vmatprep.subr.bf16.mxu1 %v7697_v8 }
 0x1b2   : > { %6951 = vmatpush3.bf16.msra.mxu0 %v7698_v9  ;;  %v7737_v9 = vld [vmem:[%s8319_s14 + $0xae0] sm:$0xff]  }
 0x1b3   : > { %6973 = vmatpush3.bf16.msra.mxu1 %v7699_v10  ;;  %6952 = vmatprep.subr.bf16.mxu0 %v7700_v11 }
 0x1b4   : > { %6974 = vmatprep.subr.bf16.mxu1 %v7701_v12  ;;  %v7738_v12 = vld [vmem:[%s8319_s14 + $0xa20] sm:$0xff]  }
 0x1b6   : > { %6953 = vmatpush3.bf16.msra.mxu0 %v7702_v14 }
 0x1b7   : > { %6975 = vmatpush3.bf16.msra.mxu1 %v7703_v16  ;;  %6954 = vmatprep.subr.bf16.mxu0 %v7704_v18  ;;  %v7740_v18 = vld [vmem:[%s8319_s14 + $0xa68] sm:$0xff]  }
 0x1b8   : > { %6976 = vmatprep.subr.bf16.mxu1 %v7705_v21  ;;  %v7742_v21 = vld [vmem:[%s8319_s14 + $0xa28] sm:$0xff]  }
 0x1ba   : > { %6955 = vmatpush3.bf16.msra.mxu0 %v7706_v24  ;;  %v7745_v24 = vld [vmem:[%s8319_s14 + $0xaf0] sm:$0xff]  }
 0x1bb   : > { %6977 = vmatpush3.bf16.msra.mxu1 %v7707_v27  ;;  %6956 = vmatprep.subr.bf16.mxu0 %v7708_v30  ;;  %v7748_v27 = vld [vmem:[%s8319_s14 + $0xa78] sm:$0xff]  }
 0x1bc   : > { %v6654_v13 = vpop.f32.mrb[8].mxu0  ;;  %6978 = vmatprep.subr.bf16.mxu1 %v7709_v32  ;;  %v7751_v30 = vld [vmem:[%s8319_s14 + $0xab8] sm:$0xff]  }
 0x1bd   : > { %v6676_v15 = vpop.f32.mrb[8].mxu1  ;;  %v6655_v17 = vpop.f32.mrb[9].mxu0  ;;  %v339_v32 = vld [vmem:[%s8312_s15 + $0x158] sm:$0xff] }
 0x1be   : > { %v6656_v19 = vadd.f32 %v6655_v17, %v6654_v13  ;;  %v6677_v20 = vpop.f32.mrb[9].mxu1  ;;  %v6657_v23 = vpop.f32.mrb[10].mxu0  ;;  %6957 = vmatpush3.bf16.msra.mxu0 %v7710_v33 }
 0x1bf   : > { %v6678_v22 = vadd.f32 %v6677_v20, %v6676_v15  ;;  %v6679_v26 = vpop.f32.mrb[10].mxu1  ;;  %v6658_v28 = vpop.f32.mrb[11].mxu0  ;;  %6979 = vmatpush3.bf16.msra.mxu1 %v7711_v34  ;;  %6958 = vmatprep.subr.bf16.mxu0 %v7712_v35  ;;  %v7739_v15 = vld [vmem:[%s8319_s14 + $0xaa0] sm:$0xff]   ;;  %v7741_v20 = vld [vmem:[%s8319_s14 + $0xae8] sm:$0xff]   ;;  %v7744_v23 = vld [vmem:[%s8319_s14 + $0xa70] sm:$0xff]   ;;  %v403_v34 = vpack.c.bf16 %v339_v32, %v339_v32 }
 0x1c0   : > { %v4715_v25 = vadd.f32 %v6656_v19, %v8644_v41  ;;  %v6680_v31 = vpop.f32.mrb[11].mxu1  ;;  %6980 = vmatprep.subr.bf16.mxu1 %v7713_v36  ;;  %v7718_v41 = vld [vmem:[%s8319_s14 + $0x938] sm:$0xff]   ;;  %v7747_v26 = vld [vmem:[%s8319_s14 + $0xab0] sm:$0xff]   ;;  %v336_v35 = vld [vmem:[%s8312_s15 + $0x140] sm:$0xff] }
 0x1c1   : > { %v7749_v28 = vld [vmem:[%s8319_s14 + $0xaf8] sm:$0xff]   ;;  %v337_v31 = vld [vmem:[%s8312_s15 + $0x148] sm:$0xff]  ;;  %v338_v36 = vld [vmem:[%s8312_s15 + $0x150] sm:$0xff] }
 0x1c2   : > { %v8683_v29 = vadd.f32 %v6678_v22, %v4715_v25  ;;  %6959 = vmatpush3.bf16.msra.mxu0 %v7714_v37  ;;  %v7743_v22 = vld [vmem:[%s8319_s14 + $0xaa8] sm:$0xff]   ;;  %v7746_v25 = vld [vmem:[%s8319_s14 + $0xa30] sm:$0xff]   ;;  %v401_v33 = vpack.c.bf16 %v337_v31, %v337_v31  ;;  %v400_v37 = vpack.c.bf16 %v336_v35, %v336_v35 }
 0x1c3   : > { %6981 = vmatpush3.bf16.msra.mxu1 %v7715_v38  ;;  %6960 = vmatprep.subr.bf16.mxu0 %v7716_v39  ;;  %v402_v38 = vpack.c.bf16 %v338_v36, %v338_v36  ;;  %v7752_v39 = vld [vmem:[%s8319_s14 + $0xb40] sm:$0xff]   ;;  %v7788_v31 = vld [vmem:[%s8319_s14 + $0xc48] sm:$0xff]   ;;  %v7792_v35 = vld [vmem:[%s8319_s14 + $0xc50] sm:$0xff]  }
 0x1c4   : > { %6982 = vmatprep.subr.bf16.mxu1 %v7717_v40  ;;  %v7753_v40 = vld [vmem:[%s8319_s14 + $0xbc0] sm:$0xff]   ;;  %v7789_v32 = vld [vmem:[%s8319_s14 + $0xcc8] sm:$0xff]   ;;  %v7793_v36 = vld [vmem:[%s8319_s14 + $0xcd0] sm:$0xff]  }
 0x1c6   : > { %6961 = vmatpush3.bf16.msra.mxu0 %v7718_v41  ;;  %v7754_v41 = vld [vmem:[%s8319_s14 + $0xb00] sm:$0xff]  }
 0x1c7   : > { %6983 = vmatpush3.bf16.msra.mxu1 %v7719_v42  ;;  %6990 = vmatprep.subr.bf16.mxu0 %v7720_v51  ;;  %v7755_v42 = vld [vmem:[%s8319_s14 + $0xb80] sm:$0xff]   ;;  %v7764_v51 = vld [vmem:[%s8319_s14 + $0xb58] sm:$0xff]  }
 0x1c8   : > { %7012 = vmatprep.subr.bf16.mxu1 %v7721_v52  ;;  %v7765_v52 = vld [vmem:[%s8319_s14 + $0xbd8] sm:$0xff]  }
 0x1c9   : > { %5273 = vmatmul.mubr.bf16.vlgmr.msra.gmra.mrb[36].mxu0 %v396_v48  ;;  %v7761_v48 = vld [vmem:[%s8319_s14 + $0xbd0] sm:$0xff]  }
 0x1ca   : > { %5313 = vmatmul.mubr.bf16.vlgmr.msra.gmra.mrb[36].mxu1 %v398_v50  ;;  %6991 = vmatpush3.bf16.msra.mxu0 %v7722_v53  ;;  %v7763_v50 = vld [vmem:[%s8319_s14 + $0xb90] sm:$0xff]  }
 0x1cb   : > { %7013 = vmatpush3.bf16.msra.mxu1 %v7723_v54  ;;  %6992 = vmatprep.subr.bf16.mxu0 %v7724_v55  ;;  %v7766_v54 = vld [vmem:[%s8319_s14 + $0xb18] sm:$0xff]  }
 0x1cc   : > { %7014 = vmatprep.subr.bf16.mxu1 %v7725_v56  ;;  %5352 = vmatprep.mubr.bf16.mxu0 %v401_v33  ;;  %v7767_v56 = vld [vmem:[%s8319_s14 + $0xb98] sm:$0xff]   ;;  %v7790_v33 = vld [vmem:[%s8319_s14 + $0xc08] sm:$0xff]  }
 0x1cd   : > { %5392 = vmatprep.mubr.bf16.mxu1 %v403_v34  ;;  %v7791_v34 = vld [vmem:[%s8319_s14 + $0xc88] sm:$0xff]  }
 0x1ce   : > { %6993 = vmatpush3.bf16.msra.mxu0 %v7726_v57 }
 0x1cf   : > { %7015 = vmatpush3.bf16.msra.mxu1 %v7727_v58  ;;  %6994 = vmatprep.subr.bf16.mxu0 %v7728_v59  ;;  %v7768_v58 = vld [vmem:[%s8319_s14 + $0xb60] sm:$0xff]  }
 0x1d0   : > { %7016 = vmatprep.subr.bf16.mxu1 %v7729_v60 }
 0x1d2   : > { %6995 = vmatpush3.bf16.msra.mxu0 %v7730_v61  ;;  %v7769_v61 = vld [vmem:[%s8319_s14 + $0xbe0] sm:$0xff]  }
 0x1d3   : > { %7017 = vmatpush3.bf16.msra.mxu1 %v7731_v62  ;;  %6996 = vmatprep.subr.bf16.mxu0 %v7732_v63 }
 0x1d4   : > { %7018 = vmatprep.subr.bf16.mxu1 %v7733_v0  ;;  %v7770_v0 = vld [vmem:[%s8319_s14 + $0xb20] sm:$0xff]  }
 0x1d6   : > { %6997 = vmatpush3.bf16.msra.mxu0 %v7734_v2 }
 0x1d7   : > { %7019 = vmatpush3.bf16.msra.mxu1 %v7735_v4  ;;  %6998 = vmatprep.subr.bf16.mxu0 %v7736_v6  ;;  %v7772_v6 = vld [vmem:[%s8319_s14 + $0xb68] sm:$0xff]  }
 0x1d8   : > { %7020 = vmatprep.subr.bf16.mxu1 %v7737_v9  ;;  %v7774_v9 = vld [vmem:[%s8319_s14 + $0xb28] sm:$0xff]  }
 0x1da   : > { %6999 = vmatpush3.bf16.msra.mxu0 %v7738_v12  ;;  %v7777_v12 = vld [vmem:[%s8319_s14 + $0xbf0] sm:$0xff]  }
 0x1db   : > { %7021 = vmatpush3.bf16.msra.mxu1 %v7739_v15  ;;  %7000 = vmatprep.subr.bf16.mxu0 %v7740_v18  ;;  %v7780_v15 = vld [vmem:[%s8319_s14 + $0xb78] sm:$0xff]  }
 0x1dc   : > { %v6698_v1 = vpop.f32.mrb[12].mxu0  ;;  %7022 = vmatprep.subr.bf16.mxu1 %v7741_v20  ;;  %v7783_v18 = vld [vmem:[%s8319_s14 + $0xbb8] sm:$0xff]  }
 0x1dd   : > { %v6720_v3 = vpop.f32.mrb[12].mxu1  ;;  %v6699_v5 = vpop.f32.mrb[13].mxu0 }
 0x1de   : > { %v6700_v7 = vadd.f32 %v6699_v5, %v6698_v1  ;;  %v6721_v8 = vpop.f32.mrb[13].mxu1  ;;  %v6701_v11 = vpop.f32.mrb[14].mxu0  ;;  %7001 = vmatpush3.bf16.msra.mxu0 %v7742_v21  ;;  %v343_v21 = vld [vmem:[%s8312_s15 + $0x178] sm:$0xff] }
 0x1df   : > { %v6722_v10 = vadd.f32 %v6721_v8, %v6720_v3  ;;  %v6723_v14 = vpop.f32.mrb[14].mxu1  ;;  %v6702_v16 = vpop.f32.mrb[15].mxu0  ;;  %7023 = vmatpush3.bf16.msra.mxu1 %v7743_v22  ;;  %7002 = vmatprep.subr.bf16.mxu0 %v7744_v23  ;;  %v7771_v3 = vld [vmem:[%s8319_s14 + $0xba0] sm:$0xff]   ;;  %v7773_v8 = vld [vmem:[%s8319_s14 + $0xbe8] sm:$0xff]   ;;  %v7776_v11 = vld [vmem:[%s8319_s14 + $0xb70] sm:$0xff]  }
 0x1e0   : > { %v4795_v13 = vadd.f32 %v6700_v7, %v8683_v29  ;;  %v6724_v19 = vpop.f32.mrb[15].mxu1  ;;  %7024 = vmatprep.subr.bf16.mxu1 %v7745_v24  ;;  %v7750_v29 = vld [vmem:[%s8319_s14 + $0xa38] sm:$0xff]   ;;  %v7779_v14 = vld [vmem:[%s8319_s14 + $0xbb0] sm:$0xff]   ;;  %v340_v22 = vld [vmem:[%s8312_s15 + $0x160] sm:$0xff]  ;;  %v407_v24 = vpack.c.bf16 %v343_v21, %v343_v21 }
 0x1e1   : > { %v7781_v16 = vld [vmem:[%s8319_s14 + $0xbf8] sm:$0xff]   ;;  %v341_v19 = vld [vmem:[%s8312_s15 + $0x168] sm:$0xff]  ;;  %v342_v23 = vld [vmem:[%s8312_s15 + $0x170] sm:$0xff] }
 0x1e2   : > { %v8722_v17 = vadd.f32 %v6722_v10, %v4795_v13  ;;  %7003 = vmatpush3.bf16.msra.mxu0 %v7746_v25  ;;  %v7775_v10 = vld [vmem:[%s8319_s14 + $0xba8] sm:$0xff]   ;;  %v7778_v13 = vld [vmem:[%s8319_s14 + $0xb30] sm:$0xff]   ;;  %v405_v20 = vpack.c.bf16 %v341_v19, %v341_v19  ;;  %v404_v25 = vpack.c.bf16 %v340_v22, %v340_v22 }
 0x1e3   : > { %7025 = vmatpush3.bf16.msra.mxu1 %v7747_v26  ;;  %7004 = vmatprep.subr.bf16.mxu0 %v7748_v27  ;;  %v406_v26 = vpack.c.bf16 %v342_v23, %v342_v23  ;;  %v7784_v27 = vld [vmem:[%s8319_s14 + $0xc40] sm:$0xff]   ;;  %v7820_v19 = vld [vmem:[%s8319_s14 + $0xd48] sm:$0xff]   ;;  %v7824_v23 = vld [vmem:[%s8319_s14 + $0xd50] sm:$0xff]  }
 0x1e4   : > { %7026 = vmatprep.subr.bf16.mxu1 %v7749_v28  ;;  %v7785_v28 = vld [vmem:[%s8319_s14 + $0xcc0] sm:$0xff]   ;;  %v7822_v21 = vld [vmem:[%s8319_s14 + $0xd08] sm:$0xff]  }
 0x1e5   : > { %v7823_v22 = vld [vmem:[%s8319_s14 + $0xd88] sm:$0xff]  }
 0x1e6   : > { %7005 = vmatpush3.bf16.msra.mxu0 %v7750_v29  ;;  %v7786_v29 = vld [vmem:[%s8319_s14 + $0xc00] sm:$0xff]  }
 0x1e7   : > { %7027 = vmatpush3.bf16.msra.mxu1 %v7751_v30  ;;  %7034 = vmatprep.subr.bf16.mxu0 %v7752_v39  ;;  %v7787_v30 = vld [vmem:[%s8319_s14 + $0xc80] sm:$0xff]   ;;  %v7796_v39 = vld [vmem:[%s8319_s14 + $0xc58] sm:$0xff]  }
 0x1e8   : > { %7056 = vmatprep.subr.bf16.mxu1 %v7753_v40  ;;  %v7797_v40 = vld [vmem:[%s8319_s14 + $0xcd8] sm:$0xff]  }
 0x1e9   : > { %5353 = vmatmul.mubr.bf16.vlgmr.msra.gmra.mrb[40].mxu0 %v400_v37  ;;  %v7794_v37 = vld [vmem:[%s8319_s14 + $0xc10] sm:$0xff]  }
 0x1ea   : > { %5393 = vmatmul.mubr.bf16.vlgmr.msra.gmra.mrb[40].mxu1 %v402_v38  ;;  %7035 = vmatpush3.bf16.msra.mxu0 %v7754_v41  ;;  %v7795_v38 = vld [vmem:[%s8319_s14 + $0xc90] sm:$0xff]  }
 0x1eb   : > { %7057 = vmatpush3.bf16.msra.mxu1 %v7755_v42  ;;  %7036 = vmatprep.subr.bf16.mxu0 %v7756_v43  ;;  %v7798_v42 = vld [vmem:[%s8319_s14 + $0xc18] sm:$0xff]  }
 0x1ec   : > { %7058 = vmatprep.subr.bf16.mxu1 %v7757_v44  ;;  %5432 = vmatprep.mubr.bf16.mxu0 %v405_v20  ;;  %v7799_v44 = vld [vmem:[%s8319_s14 + $0xc98] sm:$0xff]   ;;  %v7821_v20 = vld [vmem:[%s8319_s14 + $0xdc8] sm:$0xff]  }
 0x1ed   : > { %5472 = vmatprep.mubr.bf16.mxu1 %v407_v24  ;;  %v7825_v24 = vld [vmem:[%s8319_s14 + $0xdd0] sm:$0xff]  }
 0x1ee   : > { %7037 = vmatpush3.bf16.msra.mxu0 %v7758_v45 }
 0x1ef   : > { %7059 = vmatpush3.bf16.msra.mxu1 %v7759_v46  ;;  %7038 = vmatprep.subr.bf16.mxu0 %v7760_v47  ;;  %v7800_v46 = vld [vmem:[%s8319_s14 + $0xc60] sm:$0xff]  }
 0x1f0   : > { %7060 = vmatprep.subr.bf16.mxu1 %v7761_v48 }
 0x1f2   : > { %7039 = vmatpush3.bf16.msra.mxu0 %v7762_v49  ;;  %v7801_v49 = vld [vmem:[%s8319_s14 + $0xce0] sm:$0xff]  }
 0x1f3   : > { %7061 = vmatpush3.bf16.msra.mxu1 %v7763_v50  ;;  %7040 = vmatprep.subr.bf16.mxu0 %v7764_v51 }
 0x1f4   : > { %7062 = vmatprep.subr.bf16.mxu1 %v7765_v52  ;;  %v7802_v52 = vld [vmem:[%s8319_s14 + $0xc20] sm:$0xff]  }
 0x1f6   : > { %7041 = vmatpush3.bf16.msra.mxu0 %v7766_v54 }
 0x1f7   : > { %7063 = vmatpush3.bf16.msra.mxu1 %v7767_v56  ;;  %7042 = vmatprep.subr.bf16.mxu0 %v7768_v58  ;;  %v7804_v58 = vld [vmem:[%s8319_s14 + $0xc68] sm:$0xff]  }
 0x1f8   : > { %7064 = vmatprep.subr.bf16.mxu1 %v7769_v61  ;;  %v7806_v61 = vld [vmem:[%s8319_s14 + $0xc28] sm:$0xff]  }
 0x1fa   : > { %7043 = vmatpush3.bf16.msra.mxu0 %v7770_v0  ;;  %v7809_v0 = vld [vmem:[%s8319_s14 + $0xcf0] sm:$0xff]  }
 0x1fb   : > { %7065 = vmatpush3.bf16.msra.mxu1 %v7771_v3  ;;  %7044 = vmatprep.subr.bf16.mxu0 %v7772_v6  ;;  %v7812_v3 = vld [vmem:[%s8319_s14 + $0xc78] sm:$0xff]  }
 0x1fc   : > { %v6742_v53 = vpop.f32.mrb[16].mxu0  ;;  %7066 = vmatprep.subr.bf16.mxu1 %v7773_v8  ;;  %v7815_v6 = vld [vmem:[%s8319_s14 + $0xcb8] sm:$0xff]  }
 0x1fd   : > { %v6764_v55 = vpop.f32.mrb[16].mxu1  ;;  %v6743_v57 = vpop.f32.mrb[17].mxu0  ;;  %v347_v8 = vld [vmem:[%s8312_s15 + $0x198] sm:$0xff] }
 0x1fe   : > { %v6744_v59 = vadd.f32 %v6743_v57, %v6742_v53  ;;  %v6765_v60 = vpop.f32.mrb[17].mxu1  ;;  %v6745_v63 = vpop.f32.mrb[18].mxu0  ;;  %7045 = vmatpush3.bf16.msra.mxu0 %v7774_v9  ;;  %v344_v9 = vld [vmem:[%s8312_s15 + $0x180] sm:$0xff] }
 0x1ff   : > { %v6766_v62 = vadd.f32 %v6765_v60, %v6764_v55  ;;  %v6767_v2 = vpop.f32.mrb[18].mxu1  ;;  %v6746_v4 = vpop.f32.mrb[19].mxu0  ;;  %7067 = vmatpush3.bf16.msra.mxu1 %v7775_v10  ;;  %7046 = vmatprep.subr.bf16.mxu0 %v7776_v11  ;;  %v7803_v55 = vld [vmem:[%s8319_s14 + $0xca0] sm:$0xff]   ;;  %v7805_v60 = vld [vmem:[%s8319_s14 + $0xce8] sm:$0xff]   ;;  %v7808_v63 = vld [vmem:[%s8319_s14 + $0xc70] sm:$0xff]   ;;  %v411_v11 = vpack.c.bf16 %v347_v8, %v347_v8 }
 0x200   : > { %v4875_v1 = vadd.f32 %v6744_v59, %v8722_v17  ;;  %v6768_v7 = vpop.f32.mrb[19].mxu1  ;;  %7068 = vmatprep.subr.bf16.mxu1 %v7777_v12  ;;  %v7782_v17 = vld [vmem:[%s8319_s14 + $0xb38] sm:$0xff]   ;;  %v7811_v2 = vld [vmem:[%s8319_s14 + $0xcb0] sm:$0xff]   ;;  %v408_v12 = vpack.c.bf16 %v344_v9, %v344_v9  ;;  %v7853_v8 = vld [vmem:[%s8319_s14 + $0xec8] sm:$0xff]  }
 0x201   : > { %v7813_v4 = vld [vmem:[%s8319_s14 + $0xcf8] sm:$0xff]   ;;  %v345_v7 = vld [vmem:[%s8312_s15 + $0x188] sm:$0xff] }
 0x202   : > { %v8761_v5 = vadd.f32 %v6766_v62, %v4875_v1  ;;  %7047 = vmatpush3.bf16.msra.mxu0 %v7778_v13  ;;  %v7807_v62 = vld [vmem:[%s8319_s14 + $0xca8] sm:$0xff]   ;;  %v7810_v1 = vld [vmem:[%s8319_s14 + $0xc30] sm:$0xff]   ;;  %v409_v10 = vpack.c.bf16 %v345_v7, %v345_v7 }
 0x203   : > { %7069 = vmatpush3.bf16.msra.mxu1 %v7779_v14  ;;  %7048 = vmatprep.subr.bf16.mxu0 %v7780_v15  ;;  %v346_v13 = vld [vmem:[%s8312_s15 + $0x190] sm:$0xff]  ;;  %v7816_v15 = vld [vmem:[%s8319_s14 + $0xd40] sm:$0xff]   ;;  %v7852_v7 = vld [vmem:[%s8319_s14 + $0xe48] sm:$0xff]  }
 0x204   : > { %7070 = vmatprep.subr.bf16.mxu1 %v7781_v16  ;;  %v410_v14 = vpack.c.bf16 %v346_v13, %v346_v13  ;;  %v7817_v16 = vld [vmem:[%s8319_s14 + $0xdc0] sm:$0xff]   ;;  %v7854_v9 = vld [vmem:[%s8319_s14 + $0xe08] sm:$0xff]   ;;  %v7858_v13 = vld [vmem:[%s8319_s14 + $0xe10] sm:$0xff]  }
 0x206   : > { %7049 = vmatpush3.bf16.msra.mxu0 %v7782_v17  ;;  %v7818_v17 = vld [vmem:[%s8319_s14 + $0xd00] sm:$0xff]  }
 0x207   : > { %7071 = vmatpush3.bf16.msra.mxu1 %v7783_v18  ;;  %7078 = vmatprep.subr.bf16.mxu0 %v7784_v27  ;;  %v7819_v18 = vld [vmem:[%s8319_s14 + $0xd80] sm:$0xff]   ;;  %v7828_v27 = vld [vmem:[%s8319_s14 + $0xd58] sm:$0xff]  }
 0x208   : > { %7100 = vmatprep.subr.bf16.mxu1 %v7785_v28  ;;  %v7829_v28 = vld [vmem:[%s8319_s14 + $0xdd8] sm:$0xff]  }
 0x209   : > { %5433 = vmatmul.mubr.bf16.vlgmr.msra.gmra.mrb[44].mxu0 %v404_v25  ;;  %v7826_v25 = vld [vmem:[%s8319_s14 + $0xd10] sm:$0xff]  }
 0x20a   : > { %5473 = vmatmul.mubr.bf16.vlgmr.msra.gmra.mrb[44].mxu1 %v406_v26  ;;  %7079 = vmatpush3.bf16.msra.mxu0 %v7786_v29  ;;  %v7827_v26 = vld [vmem:[%s8319_s14 + $0xd90] sm:$0xff]  }
 0x20b   : > { %7101 = vmatpush3.bf16.msra.mxu1 %v7787_v30  ;;  %7080 = vmatprep.subr.bf16.mxu0 %v7788_v31  ;;  %v7830_v30 = vld [vmem:[%s8319_s14 + $0xd18] sm:$0xff]  }
 0x20c   : > { %7102 = vmatprep.subr.bf16.mxu1 %v7789_v32  ;;  %5512 = vmatprep.mubr.bf16.mxu0 %v409_v10  ;;  %v7831_v32 = vld [vmem:[%s8319_s14 + $0xd98] sm:$0xff]   ;;  %v7855_v10 = vld [vmem:[%s8319_s14 + $0xe88] sm:$0xff]  }
 0x20d   : > { %5552 = vmatprep.mubr.bf16.mxu1 %v411_v11  ;;  %v7856_v11 = vld [vmem:[%s8319_s14 + $0xe50] sm:$0xff]  }
 0x20e   : > { %7081 = vmatpush3.bf16.msra.mxu0 %v7790_v33 }
 0x20f   : > { %7103 = vmatpush3.bf16.msra.mxu1 %v7791_v34  ;;  %7082 = vmatprep.subr.bf16.mxu0 %v7792_v35  ;;  %v7832_v34 = vld [vmem:[%s8319_s14 + $0xd60] sm:$0xff]  }
 0x210   : > { %7104 = vmatprep.subr.bf16.mxu1 %v7793_v36 }
 0x212   : > { %7083 = vmatpush3.bf16.msra.mxu0 %v7794_v37  ;;  %v7833_v37 = vld [vmem:[%s8319_s14 + $0xde0] sm:$0xff]  }
 0x213   : > { %7105 = vmatpush3.bf16.msra.mxu1 %v7795_v38  ;;  %7084 = vmatprep.subr.bf16.mxu0 %v7796_v39 }
 0x214   : > { %7106 = vmatprep.subr.bf16.mxu1 %v7797_v40  ;;  %v7834_v40 = vld [vmem:[%s8319_s14 + $0xd20] sm:$0xff]  }
 0x216   : > { %7085 = vmatpush3.bf16.msra.mxu0 %v7798_v42 }
 0x217   : > { %7107 = vmatpush3.bf16.msra.mxu1 %v7799_v44  ;;  %7086 = vmatprep.subr.bf16.mxu0 %v7800_v46  ;;  %v7836_v46 = vld [vmem:[%s8319_s14 + $0xd68] sm:$0xff]  }
 0x218   : > { %7108 = vmatprep.subr.bf16.mxu1 %v7801_v49  ;;  %v7838_v49 = vld [vmem:[%s8319_s14 + $0xd28] sm:$0xff]  }
 0x21a   : > { %7087 = vmatpush3.bf16.msra.mxu0 %v7802_v52  ;;  %v7841_v52 = vld [vmem:[%s8319_s14 + $0xdf0] sm:$0xff]  }
 0x21b   : > { %7109 = vmatpush3.bf16.msra.mxu1 %v7803_v55  ;;  %7088 = vmatprep.subr.bf16.mxu0 %v7804_v58  ;;  %v7844_v55 = vld [vmem:[%s8319_s14 + $0xd78] sm:$0xff]  }
 0x21c   : > { %v6786_v41 = vpop.f32.mrb[20].mxu0  ;;  %7110 = vmatprep.subr.bf16.mxu1 %v7805_v60  ;;  %v7847_v58 = vld [vmem:[%s8319_s14 + $0xdb8] sm:$0xff]  }
 0x21d   : > { %v6808_v43 = vpop.f32.mrb[20].mxu1  ;;  %v6787_v45 = vpop.f32.mrb[21].mxu0  ;;  %v351_v60 = vld [vmem:[%s8312_s15 + $0x1b8] sm:$0xff] }
 0x21e   : > { %v6788_v47 = vadd.f32 %v6787_v45, %v6786_v41  ;;  %v6809_v48 = vpop.f32.mrb[21].mxu1  ;;  %v6789_v51 = vpop.f32.mrb[22].mxu0  ;;  %7089 = vmatpush3.bf16.msra.mxu0 %v7806_v61 }
 0x21f   : > { %v6810_v50 = vadd.f32 %v6809_v48, %v6808_v43  ;;  %v6811_v54 = vpop.f32.mrb[22].mxu1  ;;  %v6790_v56 = vpop.f32.mrb[23].mxu0  ;;  %7111 = vmatpush3.bf16.msra.mxu1 %v7807_v62  ;;  %7090 = vmatprep.subr.bf16.mxu0 %v7808_v63  ;;  %v7835_v43 = vld [vmem:[%s8319_s14 + $0xda0] sm:$0xff]   ;;  %v7837_v48 = vld [vmem:[%s8319_s14 + $0xde8] sm:$0xff]   ;;  %v7840_v51 = vld [vmem:[%s8319_s14 + $0xd70] sm:$0xff]   ;;  %v415_v62 = vpack.c.bf16 %v351_v60, %v351_v60 }
 0x220   : > { %v4955_v53 = vadd.f32 %v6788_v47, %v8761_v5  ;;  %v6812_v59 = vpop.f32.mrb[23].mxu1  ;;  %7112 = vmatprep.subr.bf16.mxu1 %v7809_v0  ;;  %v7814_v5 = vld [vmem:[%s8319_s14 + $0xc38] sm:$0xff]   ;;  %v7843_v54 = vld [vmem:[%s8319_s14 + $0xdb0] sm:$0xff]   ;;  %v348_v63 = vld [vmem:[%s8312_s15 + $0x1a0] sm:$0xff] }
 0x221   : > { %v7845_v56 = vld [vmem:[%s8319_s14 + $0xdf8] sm:$0xff]   ;;  %v349_v59 = vld [vmem:[%s8312_s15 + $0x1a8] sm:$0xff]  ;;  %v350_v0 = vld [vmem:[%s8312_s15 + $0x1b0] sm:$0xff] }
 0x222   : > { %v8800_v57 = vadd.f32 %v6810_v50, %v4955_v53  ;;  %7091 = vmatpush3.bf16.msra.mxu0 %v7810_v1  ;;  %v7839_v50 = vld [vmem:[%s8319_s14 + $0xda8] sm:$0xff]   ;;  %v7842_v53 = vld [vmem:[%s8319_s14 + $0xd30] sm:$0xff]   ;;  %v413_v61 = vpack.c.bf16 %v349_v59, %v349_v59  ;;  %v412_v1 = vpack.c.bf16 %v348_v63, %v348_v63 }
 0x223   : > { %7113 = vmatpush3.bf16.msra.mxu1 %v7811_v2  ;;  %7092 = vmatprep.subr.bf16.mxu0 %v7812_v3  ;;  %v414_v2 = vpack.c.bf16 %v350_v0, %v350_v0  ;;  %v7848_v3 = vld [vmem:[%s8319_s14 + $0xe40] sm:$0xff]   ;;  %v7884_v59 = vld [vmem:[%s8319_s14 + $0xf48] sm:$0xff]   ;;  %v7888_v63 = vld [vmem:[%s8319_s14 + $0xf50] sm:$0xff]  }
 0x224   : > { %7114 = vmatprep.subr.bf16.mxu1 %v7813_v4  ;;  %v7849_v4 = vld [vmem:[%s8319_s14 + $0xec0] sm:$0xff]   ;;  %v7885_v60 = vld [vmem:[%s8319_s14 + $0xfc8] sm:$0xff]   ;;  %v7889_v0 = vld [vmem:[%s8319_s14 + $0xfd0] sm:$0xff]  }
 0x226   : > { %7093 = vmatpush3.bf16.msra.mxu0 %v7814_v5  ;;  %v7850_v5 = vld [vmem:[%s8319_s14 + $0xe00] sm:$0xff]  }
 0x227   : > { %7115 = vmatpush3.bf16.msra.mxu1 %v7815_v6  ;;  %7122 = vmatprep.subr.bf16.mxu0 %v7816_v15  ;;  %v7851_v6 = vld [vmem:[%s8319_s14 + $0xe80] sm:$0xff]   ;;  %v7860_v15 = vld [vmem:[%s8319_s14 + $0xe58] sm:$0xff]  }
 0x228   : > { %7144 = vmatprep.subr.bf16.mxu1 %v7817_v16  ;;  %v7861_v16 = vld [vmem:[%s8319_s14 + $0xed8] sm:$0xff]  }
 0x229   : > { %5513 = vmatmul.mubr.bf16.vlgmr.msra.gmra.mrb[48].mxu0 %v408_v12  ;;  %v7857_v12 = vld [vmem:[%s8319_s14 + $0xed0] sm:$0xff]  }
 0x22a   : > { %5553 = vmatmul.mubr.bf16.vlgmr.msra.gmra.mrb[48].mxu1 %v410_v14  ;;  %7123 = vmatpush3.bf16.msra.mxu0 %v7818_v17  ;;  %v7859_v14 = vld [vmem:[%s8319_s14 + $0xe90] sm:$0xff]  }
 0x22b   : > { %7145 = vmatpush3.bf16.msra.mxu1 %v7819_v18  ;;  %7124 = vmatprep.subr.bf16.mxu0 %v7820_v19  ;;  %v7862_v18 = vld [vmem:[%s8319_s14 + $0xe18] sm:$0xff]  }
 0x22c   : > { %7146 = vmatprep.subr.bf16.mxu1 %v7821_v20  ;;  %5592 = vmatprep.mubr.bf16.mxu0 %v413_v61  ;;  %v7863_v20 = vld [vmem:[%s8319_s14 + $0xe98] sm:$0xff]   ;;  %v7886_v61 = vld [vmem:[%s8319_s14 + $0xf08] sm:$0xff]  }
 0x22d   : > { %5632 = vmatprep.mubr.bf16.mxu1 %v415_v62  ;;  %v7887_v62 = vld [vmem:[%s8319_s14 + $0xf88] sm:$0xff]  }
 0x22e   : > { %7125 = vmatpush3.bf16.msra.mxu0 %v7822_v21 }
 0x22f   : > { %7147 = vmatpush3.bf16.msra.mxu1 %v7823_v22  ;;  %7126 = vmatprep.subr.bf16.mxu0 %v7824_v23  ;;  %v7864_v22 = vld [vmem:[%s8319_s14 + $0xe60] sm:$0xff]  }
 0x230   : > { %7148 = vmatprep.subr.bf16.mxu1 %v7825_v24 }
 0x232   : > { %7127 = vmatpush3.bf16.msra.mxu0 %v7826_v25  ;;  %v7865_v25 = vld [vmem:[%s8319_s14 + $0xee0] sm:$0xff]  }
 0x233   : > { %7149 = vmatpush3.bf16.msra.mxu1 %v7827_v26  ;;  %7128 = vmatprep.subr.bf16.mxu0 %v7828_v27 }
 0x234   : > { %7150 = vmatprep.subr.bf16.mxu1 %v7829_v28  ;;  %v7866_v28 = vld [vmem:[%s8319_s14 + $0xe20] sm:$0xff]  }
 0x236   : > { %7129 = vmatpush3.bf16.msra.mxu0 %v7830_v30 }
 0x237   : > { %7151 = vmatpush3.bf16.msra.mxu1 %v7831_v32  ;;  %7130 = vmatprep.subr.bf16.mxu0 %v7832_v34  ;;  %v7868_v34 = vld [vmem:[%s8319_s14 + $0xe68] sm:$0xff]  }
 0x238   : > { %7152 = vmatprep.subr.bf16.mxu1 %v7833_v37  ;;  %v7870_v37 = vld [vmem:[%s8319_s14 + $0xe28] sm:$0xff]  }
 0x23a   : > { %7131 = vmatpush3.bf16.msra.mxu0 %v7834_v40  ;;  %v7873_v40 = vld [vmem:[%s8319_s14 + $0xef0] sm:$0xff]  }
 0x23b   : > { %7153 = vmatpush3.bf16.msra.mxu1 %v7835_v43  ;;  %7132 = vmatprep.subr.bf16.mxu0 %v7836_v46  ;;  %v7876_v43 = vld [vmem:[%s8319_s14 + $0xe78] sm:$0xff]  }
 0x23c   : > { %v6830_v29 = vpop.f32.mrb[24].mxu0  ;;  %7154 = vmatprep.subr.bf16.mxu1 %v7837_v48  ;;  %v7879_v46 = vld [vmem:[%s8319_s14 + $0xeb8] sm:$0xff]  }
 0x23d   : > { %v6852_v31 = vpop.f32.mrb[24].mxu1  ;;  %v6831_v33 = vpop.f32.mrb[25].mxu0 }
 0x23e   : > { %v6832_v35 = vadd.f32 %v6831_v33, %v6830_v29  ;;  %v6853_v36 = vpop.f32.mrb[25].mxu1  ;;  %v6833_v39 = vpop.f32.mrb[26].mxu0  ;;  %7133 = vmatpush3.bf16.msra.mxu0 %v7838_v49  ;;  %v355_v49 = vld [vmem:[%s8312_s15 + $0x1d8] sm:$0xff] }
 0x23f   : > { %v6854_v38 = vadd.f32 %v6853_v36, %v6852_v31  ;;  %v6855_v42 = vpop.f32.mrb[26].mxu1  ;;  %v6834_v44 = vpop.f32.mrb[27].mxu0  ;;  %7155 = vmatpush3.bf16.msra.mxu1 %v7839_v50  ;;  %7134 = vmatprep.subr.bf16.mxu0 %v7840_v51  ;;  %v7867_v31 = vld [vmem:[%s8319_s14 + $0xea0] sm:$0xff]   ;;  %v7869_v36 = vld [vmem:[%s8319_s14 + $0xee8] sm:$0xff]   ;;  %v7872_v39 = vld [vmem:[%s8319_s14 + $0xe70] sm:$0xff]  }
 0x240   : > { %v5035_v41 = vadd.f32 %v6832_v35, %v8800_v57  ;;  %v6856_v47 = vpop.f32.mrb[27].mxu1  ;;  %7156 = vmatprep.subr.bf16.mxu1 %v7841_v52  ;;  %v7846_v57 = vld [vmem:[%s8319_s14 + $0xd38] sm:$0xff]   ;;  %v7875_v42 = vld [vmem:[%s8319_s14 + $0xeb0] sm:$0xff]   ;;  %v352_v50 = vld [vmem:[%s8312_s15 + $0x1c0] sm:$0xff]  ;;  %v419_v52 = vpack.c.bf16 %v355_v49, %v355_v49 }
 0x241   : > { %v7877_v44 = vld [vmem:[%s8319_s14 + $0xef8] sm:$0xff]   ;;  %v353_v47 = vld [vmem:[%s8312_s15 + $0x1c8] sm:$0xff]  ;;  %v354_v51 = vld [vmem:[%s8312_s15 + $0x1d0] sm:$0xff] }
 0x242   : > { %v8839_v45 = vadd.f32 %v6854_v38, %v5035_v41  ;;  %7135 = vmatpush3.bf16.msra.mxu0 %v7842_v53  ;;  %v7871_v38 = vld [vmem:[%s8319_s14 + $0xea8] sm:$0xff]   ;;  %v7874_v41 = vld [vmem:[%s8319_s14 + $0xe30] sm:$0xff]   ;;  %v417_v48 = vpack.c.bf16 %v353_v47, %v353_v47  ;;  %v416_v53 = vpack.c.bf16 %v352_v50, %v352_v50 }
 0x243   : > { %7157 = vmatpush3.bf16.msra.mxu1 %v7843_v54  ;;  %7136 = vmatprep.subr.bf16.mxu0 %v7844_v55  ;;  %v418_v54 = vpack.c.bf16 %v354_v51, %v354_v51  ;;  %v7880_v55 = vld [vmem:[%s8319_s14 + $0xf40] sm:$0xff]  }
 0x244   : > { %7158 = vmatprep.subr.bf16.mxu1 %v7845_v56  ;;  %v7881_v56 = vld [vmem:[%s8319_s14 + $0xfc0] sm:$0xff]  }
 0x246   : > { %7137 = vmatpush3.bf16.msra.mxu0 %v7846_v57  ;;  %v7882_v57 = vld [vmem:[%s8319_s14 + $0xf00] sm:$0xff]  }
 0x247   : > { %7159 = vmatpush3.bf16.msra.mxu1 %v7847_v58  ;;  %7166 = vmatprep.subr.bf16.mxu0 %v7848_v3  ;;  %v7883_v58 = vld [vmem:[%s8319_s14 + $0xf80] sm:$0xff]   ;;  %v7892_v3 = vld [vmem:[%s8319_s14 + $0xf58] sm:$0xff]  }
 0x248   : > { %7188 = vmatprep.subr.bf16.mxu1 %v7849_v4  ;;  %v7893_v4 = vld [vmem:[%s8319_s14 + $0xfd8] sm:$0xff]  }
 0x249   : > { %5593 = vmatmul.mubr.bf16.vlgmr.msra.gmra.mrb[52].mxu0 %v412_v1  ;;  %v7890_v1 = vld [vmem:[%s8319_s14 + $0xf10] sm:$0xff]  }
 0x24a   : > { %5633 = vmatmul.mubr.bf16.vlgmr.msra.gmra.mrb[52].mxu1 %v414_v2  ;;  %7167 = vmatpush3.bf16.msra.mxu0 %v7850_v5  ;;  %v7891_v2 = vld [vmem:[%s8319_s14 + $0xf90] sm:$0xff]  }
 0x24b   : > { %7189 = vmatpush3.bf16.msra.mxu1 %v7851_v6  ;;  %7168 = vmatprep.subr.bf16.mxu0 %v7852_v7  ;;  %v7894_v6 = vld [vmem:[%s8319_s14 + $0xf18] sm:$0xff]  }
 0x24c   : > { %7190 = vmatprep.subr.bf16.mxu1 %v7853_v8  ;;  %5672 = vmatprep.mubr.bf16.mxu0 %v417_v48  ;;  %v7895_v8 = vld [vmem:[%s8319_s14 + $0xf98] sm:$0xff]  }
 0x24d   : > { %5712 = vmatprep.mubr.bf16.mxu1 %v419_v52 }
 0x24e   : > { %7169 = vmatpush3.bf16.msra.mxu0 %v7854_v9 }
 0x24f   : > { %7191 = vmatpush3.bf16.msra.mxu1 %v7855_v10  ;;  %7170 = vmatprep.subr.bf16.mxu0 %v7856_v11  ;;  %v7896_v10 = vld [vmem:[%s8319_s14 + $0xf60] sm:$0xff]  }
 0x250   : > { %7192 = vmatprep.subr.bf16.mxu1 %v7857_v12 }
 0x252   : > { %7171 = vmatpush3.bf16.msra.mxu0 %v7858_v13  ;;  %v7897_v13 = vld [vmem:[%s8319_s14 + $0xfe0] sm:$0xff]  }
 0x253   : > { %7193 = vmatpush3.bf16.msra.mxu1 %v7859_v14  ;;  %7172 = vmatprep.subr.bf16.mxu0 %v7860_v15 }
 0x254   : > { %7194 = vmatprep.subr.bf16.mxu1 %v7861_v16  ;;  %v7898_v16 = vld [vmem:[%s8319_s14 + $0xf20] sm:$0xff]  }
 0x256   : > { %7173 = vmatpush3.bf16.msra.mxu0 %v7862_v18 }
 0x257   : > { %7195 = vmatpush3.bf16.msra.mxu1 %v7863_v20  ;;  %7174 = vmatprep.subr.bf16.mxu0 %v7864_v22  ;;  %v7900_v22 = vld [vmem:[%s8319_s14 + $0xf68] sm:$0xff]  }
 0x258   : > { %7196 = vmatprep.subr.bf16.mxu1 %v7865_v25  ;;  %v7902_v25 = vld [vmem:[%s8319_s14 + $0xf28] sm:$0xff]  }
 0x25a   : > { %7175 = vmatpush3.bf16.msra.mxu0 %v7866_v28  ;;  %v7905_v28 = vld [vmem:[%s8319_s14 + $0xff0] sm:$0xff]  }
 0x25b   : > { %7197 = vmatpush3.bf16.msra.mxu1 %v7867_v31  ;;  %7176 = vmatprep.subr.bf16.mxu0 %v7868_v34  ;;  %v7908_v31 = vld [vmem:[%s8319_s14 + $0xf78] sm:$0xff]  }
 0x25c   : > { %v6874_v17 = vpop.f32.mrb[28].mxu0  ;;  %7198 = vmatprep.subr.bf16.mxu1 %v7869_v36  ;;  %v7911_v34 = vld [vmem:[%s8319_s14 + $0xfb8] sm:$0xff]  }
 0x25d   : > { %v6896_v19 = vpop.f32.mrb[28].mxu1  ;;  %v6875_v21 = vpop.f32.mrb[29].mxu0  ;;  %v359_v36 = vld [vmem:[%s8312_s15 + $0x1f8] sm:$0xff] }
 0x25e   : > { %v6876_v23 = vadd.f32 %v6875_v21, %v6874_v17  ;;  %v6897_v24 = vpop.f32.mrb[29].mxu1  ;;  %v6877_v27 = vpop.f32.mrb[30].mxu0  ;;  %7177 = vmatpush3.bf16.msra.mxu0 %v7870_v37  ;;  %v356_v37 = vld [vmem:[%s8312_s15 + $0x1e0] sm:$0xff] }
 0x25f   : > { %v6898_v26 = vadd.f32 %v6897_v24, %v6896_v19  ;;  %v6899_v30 = vpop.f32.mrb[30].mxu1  ;;  %v6878_v32 = vpop.f32.mrb[31].mxu0  ;;  %7199 = vmatpush3.bf16.msra.mxu1 %v7871_v38  ;;  %7178 = vmatprep.subr.bf16.mxu0 %v7872_v39  ;;  %v7899_v19 = vld [vmem:[%s8319_s14 + $0xfa0] sm:$0xff]   ;;  %v7901_v24 = vld [vmem:[%s8319_s14 + $0xfe8] sm:$0xff]   ;;  %v7904_v27 = vld [vmem:[%s8319_s14 + $0xf70] sm:$0xff]   ;;  %v423_v39 = vpack.c.bf16 %v359_v36, %v359_v36 }
 0x260   : > { %v5115_v29 = vadd.f32 %v6876_v23, %v8839_v45  ;;  %v6900_v35 = vpop.f32.mrb[31].mxu1  ;;  %7200 = vmatprep.subr.bf16.mxu1 %v7873_v40  ;;  %v7878_v45 = vld [vmem:[%s8319_s14 + $0xe38] sm:$0xff]   ;;  %v7907_v30 = vld [vmem:[%s8319_s14 + $0xfb0] sm:$0xff]   ;;  %v420_v40 = vpack.c.bf16 %v356_v37, %v356_v37 }
 0x261   : > { %v7909_v32 = vld [vmem:[%s8319_s14 + $0xff8] sm:$0xff]   ;;  %v357_v35 = vld [vmem:[%s8312_s15 + $0x1e8] sm:$0xff] }
 0x262   : > { %v8878_v33 = vadd.f32 %v6898_v26, %v5115_v29  ;;  %7179 = vmatpush3.bf16.msra.mxu0 %v7874_v41  ;;  %v7903_v26 = vld [vmem:[%s8319_s14 + $0xfa8] sm:$0xff]   ;;  %v7906_v29 = vld [vmem:[%s8319_s14 + $0xf30] sm:$0xff]   ;;  %v421_v38 = vpack.c.bf16 %v357_v35, %v357_v35 }
 0x263   : > { %7201 = vmatpush3.bf16.msra.mxu1 %v7875_v42  ;;  %7180 = vmatprep.subr.bf16.mxu0 %v7876_v43  ;;  %v358_v41 = vld [vmem:[%s8312_s15 + $0x1f0] sm:$0xff] }
 0x264   : > { %7202 = vmatprep.subr.bf16.mxu1 %v7877_v44  ;;  %v422_v42 = vpack.c.bf16 %v358_v41, %v358_v41 }
 0x266   : > { %7181 = vmatpush3.bf16.msra.mxu0 %v7878_v45 }
 0x267   : > { %7203 = vmatpush3.bf16.msra.mxu1 %v7879_v46  ;;  %7210 = vmatprep.subr.bf16.mxu0 %v7880_v55 }
 0x268   : > { %7232 = vmatprep.subr.bf16.mxu1 %v7881_v56 }
 0x269   : > { %5673 = vmatmul.mubr.bf16.vlgmr.msra.gmra.mrb[56].mxu0 %v416_v53 }
 0x26a   : > { %5713 = vmatmul.mubr.bf16.vlgmr.msra.gmra.mrb[56].mxu1 %v418_v54  ;;  %7211 = vmatpush3.bf16.msra.mxu0 %v7882_v57 }
 0x26b   : > { %7233 = vmatpush3.bf16.msra.mxu1 %v7883_v58  ;;  %7212 = vmatprep.subr.bf16.mxu0 %v7884_v59 }
 0x26c   : > { %7234 = vmatprep.subr.bf16.mxu1 %v7885_v60  ;;  %5752 = vmatprep.mubr.bf16.mxu0 %v421_v38 }
 0x26d   : > { %5792 = vmatprep.mubr.bf16.mxu1 %v423_v39 }
 0x26e   : > { %7213 = vmatpush3.bf16.msra.mxu0 %v7886_v61 }
 0x26f   : > { %7235 = vmatpush3.bf16.msra.mxu1 %v7887_v62  ;;  %7214 = vmatprep.subr.bf16.mxu0 %v7888_v63 }
 0x270   : > { %7236 = vmatprep.subr.bf16.mxu1 %v7889_v0 }
 0x272   : > { %7215 = vmatpush3.bf16.msra.mxu0 %v7890_v1 }
 0x273   : > { %7237 = vmatpush3.bf16.msra.mxu1 %v7891_v2  ;;  %7216 = vmatprep.subr.bf16.mxu0 %v7892_v3 }
 0x274   : > { %7238 = vmatprep.subr.bf16.mxu1 %v7893_v4 }
 0x276   : > { %7217 = vmatpush3.bf16.msra.mxu0 %v7894_v6 }
 0x277   : > { %7239 = vmatpush3.bf16.msra.mxu1 %v7895_v8  ;;  %7218 = vmatprep.subr.bf16.mxu0 %v7896_v10 }
 0x278   : > { %7240 = vmatprep.subr.bf16.mxu1 %v7897_v13 }
 0x27a   : > { %7219 = vmatpush3.bf16.msra.mxu0 %v7898_v16 }
 0x27b   : > { %7241 = vmatpush3.bf16.msra.mxu1 %v7899_v19  ;;  %7220 = vmatprep.subr.bf16.mxu0 %v7900_v22 }
 0x27c   : > { %v6918_v5 = vpop.f32.mrb[32].mxu0  ;;  %7242 = vmatprep.subr.bf16.mxu1 %v7901_v24 }
 0x27d   : > { %v6940_v7 = vpop.f32.mrb[32].mxu1  ;;  %v6919_v9 = vpop.f32.mrb[33].mxu0 }
 0x27e   : > { %v6920_v11 = vadd.f32 %v6919_v9, %v6918_v5  ;;  %v6941_v12 = vpop.f32.mrb[33].mxu1  ;;  %v6921_v15 = vpop.f32.mrb[34].mxu0  ;;  %7221 = vmatpush3.bf16.msra.mxu0 %v7902_v25 }
 0x27f   : > { %v6942_v14 = vadd.f32 %v6941_v12, %v6940_v7  ;;  %v6943_v18 = vpop.f32.mrb[34].mxu1  ;;  %v6922_v20 = vpop.f32.mrb[35].mxu0  ;;  %7243 = vmatpush3.bf16.msra.mxu1 %v7903_v26  ;;  %7222 = vmatprep.subr.bf16.mxu0 %v7904_v27 }
 0x280   : > { %v5195_v17 = vadd.f32 %v6920_v11, %v8878_v33  ;;  %v6944_v23 = vpop.f32.mrb[35].mxu1  ;;  %7244 = vmatprep.subr.bf16.mxu1 %v7905_v28  ;;  %v7910_v33 = vld [vmem:[%s8319_s14 + $0xf38] sm:$0xff]  }
 0x282   : > { %v5235_v21 = vadd.f32 %v6942_v14, %v5195_v17  ;;  %7223 = vmatpush3.bf16.msra.mxu0 %v7906_v29 }
 0x283   : > { %7245 = vmatpush3.bf16.msra.mxu1 %v7907_v30  ;;  %7224 = vmatprep.subr.bf16.mxu0 %v7908_v31 }
 0x284   : > { %7246 = vmatprep.subr.bf16.mxu1 %v7909_v32 }
 0x286   : > { %7225 = vmatpush3.bf16.msra.mxu0 %v7910_v33 }
 0x287   : > { %7247 = vmatpush3.bf16.msra.mxu1 %v7911_v34 }
 0x289   : > { %5753 = vmatmul.mubr.bf16.vlgmr.msra.gmra.mrb[60].mxu0 %v420_v40 }
 0x28a   : > { %5793 = vmatmul.mubr.bf16.vlgmr.msra.gmra.mrb[60].mxu1 %v422_v42 }
 0x29c   : > { %v6962_v43 = vpop.f32.mrb[36].mxu0 }
 0x29d   : > { %v6984_v44 = vpop.f32.mrb[36].mxu1  ;;  %v6963_v45 = vpop.f32.mrb[37].mxu0 }
 0x29e   : > { %v6985_v46 = vpop.f32.mrb[37].mxu1  ;;  %v6964_v47 = vadd.f32 %v6963_v45, %v6962_v43  ;;  %v6965_v49 = vpop.f32.mrb[38].mxu0 }
 0x29f   : > { %v6986_v48 = vadd.f32 %v6985_v46, %v6984_v44  ;;  %v6987_v50 = vpop.f32.mrb[38].mxu1  ;;  %v6966_v51 = vpop.f32.mrb[39].mxu0 }
 0x2a0   : > { %v6988_v52 = vpop.f32.mrb[39].mxu1  ;;  %v5275_v53 = vadd.f32 %v6964_v47, %v5235_v21 }
 0x2a2   : > { %v5315_v54 = vadd.f32 %v6986_v48, %v5275_v53 }
 0x2bc   : > { %v7006_v55 = vpop.f32.mrb[40].mxu0 }
 0x2bd   : > { %v7028_v56 = vpop.f32.mrb[40].mxu1  ;;  %v7007_v57 = vpop.f32.mrb[41].mxu0 }
 0x2be   : > { %v7008_v58 = vadd.f32 %v7007_v57, %v7006_v55  ;;  %v7029_v59 = vpop.f32.mrb[41].mxu1  ;;  %v7009_v60 = vpop.f32.mrb[42].mxu0 }
 0x2bf   : > { %v7030_v61 = vadd.f32 %v7029_v59, %v7028_v56  ;;  %v7031_v62 = vpop.f32.mrb[42].mxu1  ;;  %v7010_v63 = vpop.f32.mrb[43].mxu0 }
 0x2c0   : > { %v5355_v0 = vadd.f32 %v7008_v58, %v5315_v54  ;;  %v7032_v1 = vpop.f32.mrb[43].mxu1 }
 0x2c2   : > { %v5395_v2 = vadd.f32 %v7030_v61, %v5355_v0 }
 0x2dc   : > { %v7050_v3 = vpop.f32.mrb[44].mxu0 }
 0x2dd   : > { %v7072_v4 = vpop.f32.mrb[44].mxu1  ;;  %v7051_v5 = vpop.f32.mrb[45].mxu0 }
 0x2de   : > { %v7052_v6 = vadd.f32 %v7051_v5, %v7050_v3  ;;  %v7073_v7 = vpop.f32.mrb[45].mxu1  ;;  %v7053_v8 = vpop.f32.mrb[46].mxu0 }
 0x2df   : > { %v7074_v9 = vadd.f32 %v7073_v7, %v7072_v4  ;;  %v7075_v10 = vpop.f32.mrb[46].mxu1  ;;  %v7054_v11 = vpop.f32.mrb[47].mxu0 }
 0x2e0   : > { %v5435_v12 = vadd.f32 %v7052_v6, %v5395_v2  ;;  %v7076_v13 = vpop.f32.mrb[47].mxu1 }
 0x2e2   : > { %v5475_v14 = vadd.f32 %v7074_v9, %v5435_v12 }
 0x2fc   : > { %v7094_v15 = vpop.f32.mrb[48].mxu0 }
 0x2fd   : > { %v7116_v16 = vpop.f32.mrb[48].mxu1  ;;  %v7095_v17 = vpop.f32.mrb[49].mxu0 }
 0x2fe   : > { %v7117_v18 = vpop.f32.mrb[49].mxu1  ;;  %v7096_v19 = vadd.f32 %v7095_v17, %v7094_v15  ;;  %v7097_v21 = vpop.f32.mrb[50].mxu0 }
 0x2ff   : > { %v7118_v20 = vadd.f32 %v7117_v18, %v7116_v16  ;;  %v7119_v22 = vpop.f32.mrb[50].mxu1  ;;  %v7098_v23 = vpop.f32.mrb[51].mxu0 }
 0x300   : > { %v7120_v24 = vpop.f32.mrb[51].mxu1  ;;  %v5515_v25 = vadd.f32 %v7096_v19, %v5475_v14 }
 0x302   : > { %v5555_v26 = vadd.f32 %v7118_v20, %v5515_v25 }
 0x31c   : > { %v7138_v27 = vpop.f32.mrb[52].mxu0 }
 0x31d   : > { %v7160_v28 = vpop.f32.mrb[52].mxu1  ;;  %v7139_v29 = vpop.f32.mrb[53].mxu0 }
 0x31e   : > { %v7140_v30 = vadd.f32 %v7139_v29, %v7138_v27  ;;  %v7161_v31 = vpop.f32.mrb[53].mxu1  ;;  %v7141_v32 = vpop.f32.mrb[54].mxu0 }
 0x31f   : > { %v7162_v33 = vadd.f32 %v7161_v31, %v7160_v28  ;;  %v7163_v34 = vpop.f32.mrb[54].mxu1  ;;  %v7142_v35 = vpop.f32.mrb[55].mxu0 }
 0x320   : > { %v5595_v36 = vadd.f32 %v7140_v30, %v5555_v26  ;;  %v7164_v37 = vpop.f32.mrb[55].mxu1 }
 0x322   : > { %v5635_v38 = vadd.f32 %v7162_v33, %v5595_v36 }
 0x33c   : > { %v7182_v39 = vpop.f32.mrb[56].mxu0 }
 0x33d   : > { %v7204_v40 = vpop.f32.mrb[56].mxu1  ;;  %v7183_v41 = vpop.f32.mrb[57].mxu0 }
 0x33e   : > { %v7184_v42 = vadd.f32 %v7183_v41, %v7182_v39  ;;  %v7205_v43 = vpop.f32.mrb[57].mxu1  ;;  %v7185_v44 = vpop.f32.mrb[58].mxu0 }
 0x33f   : > { %v7206_v45 = vadd.f32 %v7205_v43, %v7204_v40  ;;  %v7207_v46 = vpop.f32.mrb[58].mxu1  ;;  %v7186_v47 = vpop.f32.mrb[59].mxu0 }
 0x340   : > { %v5675_v48 = vadd.f32 %v7184_v42, %v5635_v38  ;;  %v7208_v49 = vpop.f32.mrb[59].mxu1 }
 0x342   : > { %v5715_v50 = vadd.f32 %v7206_v45, %v5675_v48 }
 0x35c   : > { %v7226_v51 = vpop.f32.mrb[60].mxu0  ;;  %5803 = sbr.rel (%p9023_p6) target bundleno = 869 (0x365), region = 60 }
 0x35d   : > { %v7248_v52 = vpop.f32.mrb[60].mxu1  ;;  %v7227_v53 = vpop.f32.mrb[61].mxu0 }
 0x35e   : > { %v7249_v54 = vpop.f32.mrb[61].mxu1  ;;  %v7228_v55 = vadd.f32 %v7227_v53, %v7226_v51  ;;  %v7229_v57 = vpop.f32.mrb[62].mxu0 }
 0x35f   : > { %v7250_v56 = vadd.f32 %v7249_v54, %v7248_v52  ;;  %v7251_v58 = vpop.f32.mrb[62].mxu1  ;;  %v7230_v59 = vpop.f32.mrb[63].mxu0 }
 0x360   : > { %v7252_v60 = vpop.f32.mrb[63].mxu1  ;;  %v5755_v61 = vadd.f32 %v7228_v55, %v5715_v50 }
 0x362   : > { %v5795_v62 = vadd.f32 %v7250_v56, %v5755_v61 }
 0x364   : > { %5804 = vst [vmem:[#allocation2] sm:$0xff] %v5795_v62 }
 0x365 PF: > { %p6542_p12 = scmp.le.s32.totalorder %s8138_s22, 0 }
 0x367   : > { %5808 = sbr.rel (%p6542_p12) target bundleno = 879 (0x36f), region = 64 }
 0x36b   : > { %v5809_v63 = vld [vmem:[#allocation2] sm:$0xff] (!%p6542_p12) }
 0x36c   : > { %v5810_v0 = vadd.f32 (!%p6542_p12), %v5809_v63, %v5795_v62 }
 0x36e   : > { %5811 = vst [vmem:[#allocation2] sm:$0xff] %v5810_v0 }
 0x36f PF: > { %p6543_p0 = scmp.ne.s32.totalorder %s8138_s22, 1 }
 0x370   : > { %v5826_v1 = vld [vmem:[%s9007_s3] sm:$0xff] (!%p6543_p0)  ;;  %v5827_v2 = vld [vmem:[%s9007_s3 + $0x8] sm:$0xff] (!%p6543_p0)  ;;  %v5828_v3 = vld [vmem:[%s9007_s3 + $0x10] sm:$0xff] (!%p6543_p0)  ;;  %v8086_v4 = vmov (!%p6543_p0), 0.0|0.0   ;;  %vm8087_vm0 = vmmov (!%p6543_p0), 0   ;;  %v8088_v7 = vmov (!%p6543_p0), 0.0  }
 0x371   : > { %5815 = sbr.rel (%p6543_p0) target bundleno = 1443 (0x5a3), region = 68  ;;  %7306 = vmatprep.subr.bf16.mxu0 (!%p6543_p0), %v8086_v4  ;;  %v7307_v5 = vpack.c.bf16 (!%p6543_p0), %v5827_v2, %v5826_v1  ;;  %v5829_v6 = vld [vmem:[%s9007_s3 + $0x18] sm:$0xff] (!%p6543_p0)  ;;  %7303 = vmatprep.mubr.msk.f32.mxu0 (!%p6543_p0), %vm8087_vm0, %v8088_v7  ;;  %v5830_v9 = vld [vmem:[%s9007_s3 + $0x20] sm:$0xff] (!%p6543_p0)  ;;  %v5831_v10 = vld [vmem:[%s9007_s3 + $0x28] sm:$0xff] (!%p6543_p0)  ;;  %vm5919_vm1 = vcmask (!%p6543_p0), 15360  }
 0x372   : > { %v7310_v8 = vpack.c.bf16 (!%p6543_p0), %v5829_v6, %v5828_v3  ;;  %v7313_v11 = vpack.c.bf16 (!%p6543_p0), %v5831_v10, %v5830_v9  ;;  %v5832_v12 = vld [vmem:[%s9007_s3 + $0x30] sm:$0xff] (!%p6543_p0)  ;;  %v5833_v13 = vld [vmem:[%s9007_s3 + $0x38] sm:$0xff] (!%p6543_p0)  ;;  %v5834_v15 = vld [vmem:[%s9007_s3 + $0x40] sm:$0xff] (!%p6543_p0) }
 0x373   : > { %7308 = vmatpush3.bf16.msra.mxu0 (!%p6543_p0), %v7307_v5  ;;  %v7316_v14 = vpack.c.bf16 (!%p6543_p0), %v5833_v13, %v5832_v12  ;;  %v5835_v16 = vld [vmem:[%s9007_s3 + $0x48] sm:$0xff] (!%p6543_p0)  ;;  %v5836_v18 = vld [vmem:[%s9007_s3 + $0x50] sm:$0xff] (!%p6543_p0)  ;;  %v5837_v19 = vld [vmem:[%s9007_s3 + $0x58] sm:$0xff] (!%p6543_p0) }
 0x374   : > { %7309 = vmatprep.subr.bf16.mxu0 (!%p6543_p0), %v8086_v4  ;;  %v7319_v17 = vpack.c.bf16 (!%p6543_p0), %v5835_v16, %v5834_v15  ;;  %v7322_v20 = vpack.c.bf16 (!%p6543_p0), %v5837_v19, %v5836_v18  ;;  %v5838_v21 = vld [vmem:[%s9007_s3 + $0x60] sm:$0xff] (!%p6543_p0)  ;;  %v5839_v22 = vld [vmem:[%s9007_s3 + $0x68] sm:$0xff] (!%p6543_p0)  ;;  %v5840_v26 = vld [vmem:[%s9007_s3 + $0x70] sm:$0xff] (!%p6543_p0) }
 0x375   : > { %v7325_v23 = vpack.c.bf16 (!%p6543_p0), %v5839_v22, %v5838_v21  ;;  %v5816_v24 = vld [vmem:[#allocation2] sm:$0xff] (!%p6543_p0)  ;;  %v6544_v25 = vld [vmem:[#allocation7] ss:$0 sm:$0xff] (!%p6543_p0)  ;;  %v5841_v27 = vld [vmem:[%s9007_s3 + $0x78] sm:$0xff] (!%p6543_p0) }
 0x376   : > { %v5824_v28 = vadd.f32 (!%p6543_p0), %v6544_v25, %v5816_v24  ;;  %v7328_v29 = vpack.c.bf16 (!%p6543_p0), %v5841_v27, %v5840_v26  ;;  %v6545_v31 = vld [vmem:[#allocation8] ss:$0 sm:$0xff] (!%p6543_p0) }
 0x377   : > { %7311 = vmatpush3.bf16.msra.mxu0 (!%p6543_p0), %v7310_v8 }
 0x378   : > { %7312 = vmatprep.subr.bf16.mxu0 %v8086_v4  ;;  %v5825_v30 = vmax.f32 %v5824_v28, 0.0 }
 0x37b   : > { %7314 = vmatpush3.bf16.msra.mxu0 %v7313_v11 }
 0x37c   : > { %7315 = vmatprep.subr.bf16.mxu0 %v8086_v4 }
 0x37f   : > { %7317 = vmatpush3.bf16.msra.mxu0 %v7316_v14 }
 0x380   : > { %7318 = vmatprep.subr.bf16.mxu0 %v8086_v4 }
 0x383   : > { %7320 = vmatpush3.bf16.msra.mxu0 %v7319_v17 }
 0x384   : > { %7321 = vmatprep.subr.bf16.mxu0 %v8086_v4 }
 0x387   : > { %7323 = vmatpush3.bf16.msra.mxu0 %v7322_v20 }
 0x388   : > { %7324 = vmatprep.subr.bf16.mxu0 %v8086_v4 }
 0x38b   : > { %7326 = vmatpush3.bf16.msra.mxu0 %v7325_v23 }
 0x38c   : > { %7327 = vmatprep.subr.bf16.mxu0 %v8086_v4 }
 0x38f   : > { %7329 = vmatpush3.bf16.msra.mxu0 %v7328_v29 }
 0x392   : > { %7304 = vmatmul.mubr.f32.vlgmr.msra.gmra.mrb[0].mxu0 %v5825_v30 }
 0x465   : > { %v5915_v32 = vpop.f32.mrb[0].mxu0 }
 0x466   : > { %v5916_v33 = vadd.f32 %v6545_v31, %v5915_v32  ;;  %v7305_v34 = vpop.f32.mrb[1].mxu0 }
 0x468   : > { %v5920_v35 = vsel %vm5919_vm1, %v5916_v33, -inf }
 0x469   : > { %5921 = vmax.xlane.f32.xlu0 %v5920_v35 }
 0x4f6   : > { %v5922_v36 = vpop.xlane.xlu0 %5921 }
 0x4f7   : > { %v5923_v37 = vsub.f32 %v5916_v33, %v5922_v36 }
 0x4f9   : > { %v5924_v38 = vmul.f32 1.442695, %v5923_v37 }
 0x4fb   : > { %7912 = vpow2.f32 %v5924_v38 }
 0x505   : > { %v7913_v39 = vpop.eup %7912 }
 0x506   : > { %v5926_v40 = vsel %vm5919_vm1, %v7913_v39, 0.0 }
 0x507   : > { %5927 = vadd.xlane.f32.xlu0 %v5926_v40 }
 0x594   : > { %v5928_v41 = vpop.xlane.xlu0 %5927 }
 0x595   : > { %7914 = vrcp.f32 %v5928_v41 }
 0x59f   : > { %v7915_v42 = vpop.eup %7914 }
 0x5a0   : > { %v5930_v43 = vmul.f32 %v7915_v42, %v7913_v39 }
 0x5a2   : > { %5931 = vst.msk [vmem:[%s9009_s5] sm:$0xff] %vm5919_vm1, %v5930_v43 }
 0x5a3 PF: > { %p19_p2 = scmp.ge.s32.totalorder %s8166_s30, 4   ;;  %s9024_s18 = smov %s8070_s19 }
 0x5a4   : > { %s9025_s19 = smov %s8074_s20  ;;  %s9026_s20 = smov %s8226_s29 }
 0x5a5   : > { %s9027_s21 = smov %s8166_s30  ;;  %21 = sbr.rel (!%p19_p2) target bundleno = 6 (0x6), region = 109 }
 0x5ac   :  { %5943 = vsyncpa [#allocation4], 1 }
 0x5ad   :  { %5945 = vsyncpa [#allocation4 + $0x1], 1 }
 0x5ae   :  { %5946 = vsyncpa [#allocation6], 1 }
 0x5af   :  { %5948 = vsyncpa [#allocation6 + $0x1], 1 }
 0x5b0   :  { %5949 = vsyncpa [#allocation9], 1 }

</bundles_post_ra>
